<compile_context>
chip_gen: v5e
topology: v5e:2x2
jax: 0.10.0
libtpu: 0.0.40
codegen_flags: <defaults>
</compile_context>

<pallas_src>
import functools

import jax
import jax.numpy as jnp
from jax.experimental import pallas as pl
from jax.experimental.pallas import tpu as pltpu

_PHASES = ((0, 0), (0, 1), (1, 0), (1, 1))   # output parity (dy, dx)


# ---------------------------------------------------------------------------
# small helpers
# ---------------------------------------------------------------------------
def _round_up(n, m):
    return ((n + m - 1) // m) * m


def _pad_to(x, shape):
    return jnp.pad(x, [(0, s - d) for d, s in zip(x.shape, shape)])


@functools.lru_cache(maxsize=1)
def _tpu_budget():
    """(lane-tile target, vmem_limit_bytes) tuned per TPU generation."""
    try:
        kind = jax.devices()[0].device_kind.lower()
    except Exception:
        kind = ""
    if "v5" in kind or "v6" in kind:
        # 128 MiB physical VMEM, 1 TensorCore: big lane tiles, generous limit.
        return 8192, 80 * 1024 * 1024
    # v7x (64 MiB VMEM, 2 TCs) or unknown generation: conservative budget.
    return 4096, 48 * 1024 * 1024


def _choose_tiling(P):
    """Lane-tile and padded lane extent for a spatial axis of P output pixels."""
    target, _ = _tpu_budget()
    tp = min(target, _round_up(P, 128))
    # Force >= 2 grid steps for mid/large layers (v7x has 2 TensorCores; on
    # single-TC chips the extra step is negligible).
    if _round_up(P, tp) == tp and tp >= 512:
        tp = _round_up(tp // 2, 128)
    return tp, _round_up(P, tp)


# ---------------------------------------------------------------------------
# Pallas kernel: block-complex GEMM + bias + epilogue
# ---------------------------------------------------------------------------
def _cgemm_kernel(*refs, relu, fuse_phase):
    """Block-complex GEMM (transposed layout) + bias + epilogue.

      W  : (C2, K2) bf16   packed [real|imag] output rows (x4 parities for up)
      b  : (C2, 1)  f32    rows = (br - bi | br + bi) per output block
      X  : (K2, TP) bf16   rows = [x_real taps ; x_imag taps], lanes = spatial
      amp: (4,  TP) f32    target amplitude per output parity (fuse_phase only)
      O  : (C2, TP) f32
    """
    if fuse_phase:
        w_ref, b_ref, x_ref, amp_ref, o_ref = refs
    else:
        w_ref, b_ref, x_ref, o_ref = refs

    acc = jnp.dot(w_ref[...], x_ref[...],
                  preferred_element_type=jnp.float32) + b_ref[...]
    if relu:                                      # complex_relu on packed rows
        acc = jnp.maximum(acc, 0.0)

    if fuse_phase:
        # net5.u1 (cout==1): amp * exp(i * atan2(re, im)) per output parity.
        #   cos = im/|.| , sin = re/|.| ; atan2(0,0)=0 -> (cos,sin)=(1,0)
        for p in range(4):
            re = acc[2 * p:2 * p + 1, :]
            im = acc[2 * p + 1:2 * p + 2, :]
            sq = re * re + im * im
            nz = sq > 0.0
            rinv = jax.lax.rsqrt(jnp.where(nz, sq, 1.0))      # EUP slot
            amp = amp_ref[p:p + 1, :]
            o_ref[2 * p:2 * p + 1, :] = amp * jnp.where(nz, im * rinv, 1.0)
            o_ref[2 * p + 1:2 * p + 2, :] = amp * jnp.where(nz, re * rinv, 0.0)
    else:
        o_ref[...] = acc


def _run_cgemm(x, w, bias, *, relu, tp, amp=None):
    """One pallas_call per conv layer: single GEMM, grid over the lane axis."""
    c2, k2 = w.shape
    p_pad = x.shape[1]
    _, vmem_limit = _tpu_budget()
    fuse = amp is not None

    in_specs = [pl.BlockSpec((c2, k2), lambda i: (0, 0)),
                pl.BlockSpec((c2, 1), lambda i: (0, 0)),
                pl.BlockSpec((k2, tp), lambda i: (0, i))]
    args = [w, bias, x]
    if fuse:
        in_specs.append(pl.BlockSpec((4, tp), lambda i: (0, i)))
        args.append(amp)

    return pl.pallas_call(
        functools.partial(_cgemm_kernel, relu=relu, fuse_phase=fuse),
        out_shape=jax.ShapeDtypeStruct((c2, p_pad), jnp.float32),
        grid=(p_pad // tp,),
        in_specs=in_specs,
        out_specs=pl.BlockSpec((c2, tp), lambda i: (0, i)),
        compiler_params=pltpu.CompilerParams(
            dimension_semantics=("parallel",),
            vmem_limit_bytes=vmem_limit),
    )(*args)


# ---------------------------------------------------------------------------
# JAX glue: transposed im2col, conv wrappers, network wiring
# ---------------------------------------------------------------------------
def _im2col_T(x, k, stride):
    """x: (H, W, C) already padded -> ((k*k*C, oh*ow), oh, ow).
    Row order = (tap_i, tap_j, channel); lane order = (oy, ox)."""
    H, W, C = x.shape
    oh = (H - k) // stride + 1
    ow = (W - k) // stride + 1
    rows = []
    for i in range(k):
        for j in range(k):
            patch = x[i:i + stride * oh:stride, j:j + stride * ow:stride, :]
            rows.append(patch.reshape(oh * ow, C).T)          # (C, P)
    return jnp.concatenate(rows, axis=0), oh, ow


def complex_conv_down(xr, xi, layer):
    """ComplexConv2d(k=3, s=2, p=1) + complex_relu: one GEMM pallas_call."""
    cout = layer["cout"]
    k2 = layer["w"].shape[1]
    xr_p = jnp.pad(xr, ((1, 1), (1, 1), (0, 0)))
    xi_p = jnp.pad(xi, ((1, 1), (1, 1), (0, 0)))
    xrT, oh, ow = _im2col_T(xr_p, 3, 2)
    xiT, _, _ = _im2col_T(xi_p, 3, 2)
    P = oh * ow
    tp, p_pad = _choose_tiling(P)
    x = _pad_to(jnp.concatenate([xrT, xiT], axis=0),
                (k2, p_pad)).astype(jnp.bfloat16)
    out = _run_cgemm(x, layer["w"], layer["bias"], relu=True, tp=tp)
    o_r = out[:cout, :P].T.reshape(oh, ow, cout)
    o_i = out[cout:2 * cout, :P].T.reshape(oh, ow, cout)
    return o_r, o_i


def complex_conv_up(xr, xi, layer, relu, amp=None):
    """ComplexConvTranspose2d(k=4, s=2, p=1): all 4 output parities fused into
    ONE block GEMM over a shared 3x3 union im2col of the 1-padded input.
    If `amp` is given (net5.u1) the amp*exp(i*atan2(re,im)) recombination is
    fused in the epilogue and full-res (init_r, init_i) planes are returned."""
    H, W, _ = xr.shape
    cout = layer["cout"]
    c2 = 2 * cout
    k2 = layer["w"].shape[1]

    xr_p = jnp.pad(xr, ((1, 1), (1, 1), (0, 0)))
    xi_p = jnp.pad(xi, ((1, 1), (1, 1), (0, 0)))
    xrT, _, _ = _im2col_T(xr_p, 3, 1)        # union of the 4 parity windows
    xiT, _, _ = _im2col_T(xi_p, 3, 1)
    P = H * W
    tp, p_pad = _choose_tiling(P)
    x = _pad_to(jnp.concatenate([xrT, xiT], axis=0),
                (k2, p_pad)).astype(jnp.bfloat16)

    if amp is not None:
        amps = jnp.stack([amp[dy::2, dx::2].reshape(-1) for dy, dx in _PHASES])
        amps = _pad_to(amps.astype(jnp.float32), (4, p_pad))
        out = _run_cgemm(x, layer["w"], layer["bias"], relu=relu, tp=tp,
                         amp=amps)
        # rows per parity: [amp*cos, amp*sin] -> pixel-shuffle to (2H, 2W)
        planes = out[:8, :P].reshape(2, 2, 2, H, W)       # (dy, dx, r/i, y, x)
        full = planes.transpose(2, 3, 0, 4, 1).reshape(2, 2 * H, 2 * W)
        return full[0], full[1]

    out = _run_cgemm(x, layer["w"], layer["bias"], relu=relu, tp=tp)
    planes = out[:4 * c2, :P].reshape(2, 2, c2, H, W)     # (dy, dx, c, y, x)
    full = planes.transpose(2, 3, 0, 4, 1).reshape(c2, 2 * H, 2 * W)
    out_r = jnp.moveaxis(full[:cout], 0, -1)              # (2H, 2W, cout)
    out_i = jnp.moveaxis(full[cout:], 0, -1)
    return out_r, out_i


def net5_forward(xr, xi, P):
    d1 = complex_conv_down(xr, xi, P["d1"])
    d2 = complex_conv_down(*d1, P["d2"])
    d3 = complex_conv_down(*d2, P["d3"])
    d4 = complex_conv_down(*d3, P["d4"])
    u4 = complex_conv_up(*d4, P["u4"], relu=True)
    u3 = complex_conv_up(u4[0] + d3[0], u4[1] + d3[1], P["u3"], relu=True)
    u2 = complex_conv_up(u3[0] + d2[0], u3[1] + d2[1], P["u2"], relu=True)
    # u1 (Up5, no relu) with fused recombination:
    #   phase = atan2(re, im);  init = x.real * (cos(phase) + i*sin(phase))
    return complex_conv_up(u2[0] + d1[0], u2[1] + d1[1], P["u1"],
                           relu=False, amp=xr[..., 0])


def net6_forward(xr, xi, P):
    d1 = complex_conv_down(xr, xi, P["d1"])
    d2 = complex_conv_down(*d1, P["d2"])
    d3 = complex_conv_down(*d2, P["d3"])
    u3 = complex_conv_up(*d3, P["u3"], relu=True)
    u2 = complex_conv_up(u3[0] + d2[0], u3[1] + d2[1], P["u2"], relu=True)
    u1 = complex_conv_up(u2[0] + d1[0], u2[1] + d1[1], P["u1"], relu=False)
    return u1[0][..., 0], u1[1][..., 0]


def proposednet_forward(x_complex, params, H2):
    # x_complex: (1, 1, H, W) complex64 (NCHW, as in the PyTorch module)
    xr = jnp.real(x_complex)[0, 0][..., None].astype(jnp.float32)   # (H, W, 1)
    xi = jnp.imag(x_complex)[0, 0][..., None].astype(jnp.float32)

    init_r, init_i = net5_forward(xr, xi, params["net1"])           # (H, W)

    # TODO(synk): fftn/ifftn in plain JAX (size-1 NCHW axes are identity);
    # the H2 multiply stays in XLA so it fuses with the FFTs.
    quan = jnp.fft.fftn(jax.lax.complex(init_r, init_i))
    slm = jnp.fft.ifftn(quan * H2)
    sr = jnp.real(slm).astype(jnp.float32)[..., None]
    si = jnp.imag(slm).astype(jnp.float32)[..., None]

    out_r, out_i = net6_forward(sr, si, params["net2"])             # (H, W)
    # TODO(synk): final torch.atan2 kept in plain JAX.
    return jnp.arctan2(out_r, out_i)


# ---------------------------------------------------------------------------
# Parameter init (synthetic, deterministic) + packing into GEMM-ready layout
# ---------------------------------------------------------------------------
def _init_layer(key, cin, cout, k):
    k1, k2, k3, k4 = jax.random.split(key, 4)
    s = 0.3
    return dict(
        wr=s * jax.random.normal(k1, (k, k, cin, cout), jnp.float32),
        wi=s * jax.random.normal(k2, (k, k, cin, cout), jnp.float32),
        br=s * jax.random.normal(k3, (cout,), jnp.float32),
        bi=s * jax.random.normal(k4, (cout,), jnp.float32),
    )


def init_params(key):
    keys = jax.random.split(key, 14)
    net1 = dict(
        d1=_init_layer(keys[0], 1, 2, 3), d2=_init_layer(keys[1], 2, 4, 3),
        d3=_init_layer(keys[2], 4, 8, 3), d4=_init_layer(keys[3], 8, 16, 3),
        u4=_init_layer(keys[4], 16, 8, 4), u3=_init_layer(keys[5], 8, 4, 4),
        u2=_init_layer(keys[6], 4, 2, 4), u1=_init_layer(keys[7], 2, 1, 4),
    )
    net2 = dict(
        d1=_init_layer(keys[8], 1, 2, 3), d2=_init_layer(keys[9], 2, 4, 3),
        d3=_init_layer(keys[10], 4, 8, 3),
        u3=_init_layer(keys[11], 8, 4, 4), u2=_init_layer(keys[12], 4, 2, 4),
        u1=_init_layer(keys[13], 2, 1, 4),
    )
    return dict(net1=net1, net2=net2)


def _pack_blk_T(wr_flat, wi_flat):
    """(K, cout) pair -> (2*cout, 2*K) block-complex weight (transposed GEMM):
    rows = [real outputs ; imag outputs], cols = [real-input | imag-input]."""
    top = jnp.concatenate([wr_flat, wi_flat], axis=1)        # (K, 2*cout)
    bot = jnp.concatenate([-wi_flat, wr_flat], axis=1)
    return jnp.concatenate([top, bot], axis=0).T             # (2*cout, 2*K)


def _pack_bias(br, bi):
    # complexPyTorch ComplexConv: real gets (br - bi), imag gets (br + bi)
    return jnp.concatenate([br - bi, br + bi]).reshape(-1, 1).astype(jnp.float32)


def _prep_down(p):
    k, _, cin, cout = p["wr"].shape
    K = k * k * cin
    c2 = _round_up(2 * cout, 8)
    k2 = _round_up(2 * K, 16)                 # bf16 sublane quantum on X
    w = _pad_to(_pack_blk_T(p["wr"].reshape(K, cout), p["wi"].reshape(K, cout)),
                (c2, k2)).astype(jnp.bfloat16)
    bias = _pad_to(_pack_bias(p["br"], p["bi"]), (c2, 1))
    return dict(w=w, bias=bias, cout=cout)


def _prep_up(p):
    """ConvTranspose2d(k=4, s=2, p=1) -> 4-parity weights over the SHARED 3x3
    union im2col, stacked along output rows (one fused GEMM).  For parity
    (dy, dx) the tap at padded-input offset (ui, uj), ui in {dy, dy+1},
    uj in {dx, dx+1}, uses w[3-2*ui+dy, 3-2*uj+dx] (transposed-conv tap
    reindexing, i.e. 180-deg flip of each parity sub-kernel).  Weight layout
    here is (ky, kx, cin, cout); loading real PyTorch weights would need a
    (cin, cout, k, k) -> (k, k, cin, cout) permute first."""
    _, _, cin, cout = p["wr"].shape
    c2 = 2 * cout
    K = 9 * cin
    k2 = _round_up(2 * K, 16)
    blocks = []
    for dy, dx in _PHASES:
        wr_u = jnp.zeros((3, 3, cin, cout), jnp.float32)
        wi_u = jnp.zeros((3, 3, cin, cout), jnp.float32)
        for ui in (dy, dy + 1):
            for uj in (dx, dx + 1):
                ky, kx = 3 - 2 * ui + dy, 3 - 2 * uj + dx
                wr_u = wr_u.at[ui, uj].set(p["wr"][ky, kx])
                wi_u = wi_u.at[ui, uj].set(p["wi"][ky, kx])
        blocks.append(_pack_blk_T(wr_u.reshape(K, cout), wi_u.reshape(K, cout)))
    w = _pad_to(jnp.concatenate(blocks, axis=0), (4 * c2, k2)).astype(jnp.bfloat16)
    bias = jnp.tile(_pack_bias(p["br"], p["bi"]), (4, 1))
    return dict(w=w, bias=bias, cout=cout)


def prepare_params(raw):
    n1, n2 = raw["net1"], raw["net2"]
    return dict(
        net1=dict(d1=_prep_down(n1["d1"]), d2=_prep_down(n1["d2"]),
                  d3=_prep_down(n1["d3"]), d4=_prep_down(n1["d4"]),
                  u4=_prep_up(n1["u4"]), u3=_prep_up(n1["u3"]),
                  u2=_prep_up(n1["u2"]), u1=_prep_up(n1["u1"])),
        net2=dict(d1=_prep_down(n2["d1"]), d2=_prep_down(n2["d2"]),
                  d3=_prep_down(n2["d3"]),
                  u3=_prep_up(n2["u3"]), u2=_prep_up(n2["u2"]),
                  u1=_prep_up(n2["u1"])),
    )


if __name__ == "__main__":
    Hsz = Wsz = 16  # must be divisible by 16 (4 stride-2 downsamplings in net5)
    key = jax.random.PRNGKey(0)
    kx, kp = jax.random.split(key)
    params = prepare_params(init_params(kp))

    # target amplitude (real) -> complex input, as in the reference script
    target_amp = jax.random.uniform(kx, (1, 1, Hsz, Wsz), jnp.float32)
    x = jax.lax.complex(target_amp, jnp.zeros_like(target_amp))

    # deterministic synthetic transfer function H2 (unit-modulus phase mask)
    fy, fx = jnp.meshgrid(jnp.arange(Hsz, dtype=jnp.float32),
                          jnp.arange(Wsz, dtype=jnp.float32), indexing="ij")
    H2 = jnp.exp(jax.lax.complex(jnp.zeros_like(fx),
                                 2.0 * jnp.pi * (0.05 * fx + 0.03 * fy)))

    fwd = jax.jit(functools.partial(proposednet_forward, params=params, H2=H2))
    out = fwd(x)
    jax.block_until_ready(out)
    assert out.shape == (Hsz, Wsz) and out.dtype == jnp.float32
    print("KERNEL_OK")
</pallas_src>

<mosaic_0001>
module attributes {stable_mosaic.version = 11 : i64} {
  func.func @_cgemm_kernel(%arg0: i32, %arg1: memref<8x32xbf16, #tpu.memory_space<vmem>>, %arg2: memref<8x1xf32, #tpu.memory_space<vmem>>, %arg3: memref<32x128xbf16, #tpu.memory_space<vmem>>, %arg4: memref<8x128xf32, #tpu.memory_space<vmem>>) attributes {dimension_semantics = [#tpu.dimension_semantics<parallel>], iteration_bounds = array<i64: 1>, scalar_prefetch = 0 : i64, scratch_operands = 0 : i64, tpu.core_type = #tpu.core_type<tc>, window_params = [{pipeline_mode = #tpu.pipeline_mode<synchronous>, transform_indices = @transform_0, window_bounds = array<i64: 8, 32>}, {pipeline_mode = #tpu.pipeline_mode<synchronous>, transform_indices = @transform_1, window_bounds = array<i64: 8, 1>}, {transform_indices = @transform_2, window_bounds = array<i64: 32, 128>}, {transform_indices = @transform_3, window_bounds = array<i64: 8, 128>}]} {
    %c0 = arith.constant 0 : index
    %c0_0 = arith.constant 0 : index
    %0 = vector.load %arg1[%c0, %c0_0] : memref<8x32xbf16, #tpu.memory_space<vmem>>, vector<8x32xbf16>
    %c0_1 = arith.constant 0 : index
    %c0_2 = arith.constant 0 : index
    %1 = vector.load %arg3[%c0_1, %c0_2] : memref<32x128xbf16, #tpu.memory_space<vmem>>, vector<32x128xbf16>
    %cst = arith.constant dense<0.000000e+00> : vector<8x128xf32>
    %2 = tpu.matmul %0, %1, %cst {dimension_numbers = #tpu.dot_dimension_numbers<[1], [0], [0], [1], [0, 0, 1, 1], [], []>} : vector<8x32xbf16>, vector<32x128xbf16>, vector<8x128xf32> -> vector<8x128xf32>
    %c0_3 = arith.constant 0 : index
    %c0_4 = arith.constant 0 : index
    %3 = vector.load %arg2[%c0_3, %c0_4] : memref<8x1xf32, #tpu.memory_space<vmem>>, vector<8x1xf32>
    %4 = vector.broadcast %3 : vector<8x1xf32> to vector<8x128xf32>
    %5 = arith.addf %2, %4 : vector<8x128xf32>
    %cst_5 = arith.constant 0.000000e+00 : f32
    %6 = vector.broadcast %cst_5 : f32 to vector<8x128xf32>
    %7 = arith.maximumf %5, %6 : vector<8x128xf32>
    %c0_6 = arith.constant 0 : index
    %c0_7 = arith.constant 0 : index
    %8 = vector.load %arg4[%c0_6, %c0_7] : memref<8x128xf32, #tpu.memory_space<vmem>>, vector<8x128xf32>
    tpu.vector_store %arg4[%c0_6, %c0_7], %7 {strides = array<i32>} : memref<8x128xf32, #tpu.memory_space<vmem>>, vector<8x128xf32>,
    return
  }
  func.func @transform_0(%arg0: i32) -> (i32, i32) {
    %c0_i32 = arith.constant 0 : i32
    %c0_i32_0 = arith.constant 0 : i32
    %c0_i32_1 = arith.constant 0 : i32
    return %c0_i32, %c0_i32_0 : i32, i32
  }
  func.func @transform_1(%arg0: i32) -> (i32, i32) {
    %c0_i32 = arith.constant 0 : i32
    %c0_i32_0 = arith.constant 0 : i32
    %c0_i32_1 = arith.constant 0 : i32
    return %c0_i32, %c0_i32_0 : i32, i32
  }
  func.func @transform_2(%arg0: i32) -> (i32, i32) {
    %c0_i32 = arith.constant 0 : i32
    %c0_i32_0 = arith.constant 0 : i32
    return %c0_i32, %arg0 : i32, i32
  }
  func.func @transform_3(%arg0: i32) -> (i32, i32) {
    %c0_i32 = arith.constant 0 : i32
    %c0_i32_0 = arith.constant 0 : i32
    return %c0_i32, %arg0 : i32, i32
  }
}

module attributes {stable_mosaic.version = 11 : i64} {
  func.func @_cgemm_kernel(%arg0: i32, %arg1: memref<8x48xbf16, #tpu.memory_space<vmem>>, %arg2: memref<8x1xf32, #tpu.memory_space<vmem>>, %arg3: memref<48x128xbf16, #tpu.memory_space<vmem>>, %arg4: memref<8x128xf32, #tpu.memory_space<vmem>>) attributes {dimension_semantics = [#tpu.dimension_semantics<parallel>], iteration_bounds = array<i64: 1>, scalar_prefetch = 0 : i64, scratch_operands = 0 : i64, tpu.core_type = #tpu.core_type<tc>, window_params = [{pipeline_mode = #tpu.pipeline_mode<synchronous>, transform_indices = @transform_0, window_bounds = array<i64: 8, 48>}, {pipeline_mode = #tpu.pipeline_mode<synchronous>, transform_indices = @transform_1, window_bounds = array<i64: 8, 1>}, {transform_indices = @transform_2, window_bounds = array<i64: 48, 128>}, {transform_indices = @transform_3, window_bounds = array<i64: 8, 128>}]} {
    %c0 = arith.constant 0 : index
    %c0_0 = arith.constant 0 : index
    %0 = vector.load %arg1[%c0, %c0_0] : memref<8x48xbf16, #tpu.memory_space<vmem>>, vector<8x48xbf16>
    %c0_1 = arith.constant 0 : index
    %c0_2 = arith.constant 0 : index
    %1 = vector.load %arg3[%c0_1, %c0_2] : memref<48x128xbf16, #tpu.memory_space<vmem>>, vector<48x128xbf16>
    %cst = arith.constant dense<0.000000e+00> : vector<8x128xf32>
    %2 = tpu.matmul %0, %1, %cst {dimension_numbers = #tpu.dot_dimension_numbers<[1], [0], [0], [1], [0, 0, 1, 1], [], []>} : vector<8x48xbf16>, vector<48x128xbf16>, vector<8x128xf32> -> vector<8x128xf32>
    %c0_3 = arith.constant 0 : index
    %c0_4 = arith.constant 0 : index
    %3 = vector.load %arg2[%c0_3, %c0_4] : memref<8x1xf32, #tpu.memory_space<vmem>>, vector<8x1xf32>
    %4 = vector.broadcast %3 : vector<8x1xf32> to vector<8x128xf32>
    %5 = arith.addf %2, %4 : vector<8x128xf32>
    %cst_5 = arith.constant 0.000000e+00 : f32
    %6 = vector.broadcast %cst_5 : f32 to vector<8x128xf32>
    %7 = arith.maximumf %5, %6 : vector<8x128xf32>
    %c0_6 = arith.constant 0 : index
    %c0_7 = arith.constant 0 : index
    %8 = vector.load %arg4[%c0_6, %c0_7] : memref<8x128xf32, #tpu.memory_space<vmem>>, vector<8x128xf32>
    tpu.vector_store %arg4[%c0_6, %c0_7], %7 {strides = array<i32>} : memref<8x128xf32, #tpu.memory_space<vmem>>, vector<8x128xf32>,
    return
  }
  func.func @transform_0(%arg0: i32) -> (i32, i32) {
    %c0_i32 = arith.constant 0 : i32
    %c0_i32_0 = arith.constant 0 : i32
    %c0_i32_1 = arith.constant 0 : i32
    return %c0_i32, %c0_i32_0 : i32, i32
  }
  func.func @transform_1(%arg0: i32) -> (i32, i32) {
    %c0_i32 = arith.constant 0 : i32
    %c0_i32_0 = arith.constant 0 : i32
    %c0_i32_1 = arith.constant 0 : i32
    return %c0_i32, %c0_i32_0 : i32, i32
  }
  func.func @transform_2(%arg0: i32) -> (i32, i32) {
    %c0_i32 = arith.constant 0 : i32
    %c0_i32_0 = arith.constant 0 : i32
    return %c0_i32, %arg0 : i32, i32
  }
  func.func @transform_3(%arg0: i32) -> (i32, i32) {
    %c0_i32 = arith.constant 0 : i32
    %c0_i32_0 = arith.constant 0 : i32
    return %c0_i32, %arg0 : i32, i32
  }
}

module attributes {stable_mosaic.version = 11 : i64} {
  func.func @_cgemm_kernel(%arg0: i32, %arg1: memref<16x80xbf16, #tpu.memory_space<vmem>>, %arg2: memref<16x1xf32, #tpu.memory_space<vmem>>, %arg3: memref<80x128xbf16, #tpu.memory_space<vmem>>, %arg4: memref<16x128xf32, #tpu.memory_space<vmem>>) attributes {dimension_semantics = [#tpu.dimension_semantics<parallel>], iteration_bounds = array<i64: 1>, scalar_prefetch = 0 : i64, scratch_operands = 0 : i64, tpu.core_type = #tpu.core_type<tc>, window_params = [{pipeline_mode = #tpu.pipeline_mode<synchronous>, transform_indices = @transform_0, window_bounds = array<i64: 16, 80>}, {pipeline_mode = #tpu.pipeline_mode<synchronous>, transform_indices = @transform_1, window_bounds = array<i64: 16, 1>}, {transform_indices = @transform_2, window_bounds = array<i64: 80, 128>}, {transform_indices = @transform_3, window_bounds = array<i64: 16, 128>}]} {
    %c0 = arith.constant 0 : index
    %c0_0 = arith.constant 0 : index
    %0 = vector.load %arg1[%c0, %c0_0] : memref<16x80xbf16, #tpu.memory_space<vmem>>, vector<16x80xbf16>
    %c0_1 = arith.constant 0 : index
    %c0_2 = arith.constant 0 : index
    %1 = vector.load %arg3[%c0_1, %c0_2] : memref<80x128xbf16, #tpu.memory_space<vmem>>, vector<80x128xbf16>
    %cst = arith.constant dense<0.000000e+00> : vector<16x128xf32>
    %2 = tpu.matmul %0, %1, %cst {dimension_numbers = #tpu.dot_dimension_numbers<[1], [0], [0], [1], [0, 0, 1, 1], [], []>} : vector<16x80xbf16>, vector<80x128xbf16>, vector<16x128xf32> -> vector<16x128xf32>
    %c0_3 = arith.constant 0 : index
    %c0_4 = arith.constant 0 : index
    %3 = vector.load %arg2[%c0_3, %c0_4] : memref<16x1xf32, #tpu.memory_space<vmem>>, vector<16x1xf32>
    %4 = vector.broadcast %3 : vector<16x1xf32> to vector<16x128xf32>
    %5 = arith.addf %2, %4 : vector<16x128xf32>
    %cst_5 = arith.constant 0.000000e+00 : f32
    %6 = vector.broadcast %cst_5 : f32 to vector<16x128xf32>
    %7 = arith.maximumf %5, %6 : vector<16x128xf32>
    %c0_6 = arith.constant 0 : index
    %c0_7 = arith.constant 0 : index
    %8 = vector.load %arg4[%c0_6, %c0_7] : memref<16x128xf32, #tpu.memory_space<vmem>>, vector<16x128xf32>
    tpu.vector_store %arg4[%c0_6, %c0_7], %7 {strides = array<i32>} : memref<16x128xf32, #tpu.memory_space<vmem>>, vector<16x128xf32>,
    return
  }
  func.func @transform_0(%arg0: i32) -> (i32, i32) {
    %c0_i32 = arith.constant 0 : i32
    %c0_i32_0 = arith.constant 0 : i32
    %c0_i32_1 = arith.constant 0 : i32
    return %c0_i32, %c0_i32_0 : i32, i32
  }
  func.func @transform_1(%arg0: i32) -> (i32, i32) {
    %c0_i32 = arith.constant 0 : i32
    %c0_i32_0 = arith.constant 0 : i32
    %c0_i32_1 = arith.constant 0 : i32
    return %c0_i32, %c0_i32_0 : i32, i32
  }
  func.func @transform_2(%arg0: i32) -> (i32, i32) {
    %c0_i32 = arith.constant 0 : i32
    %c0_i32_0 = arith.constant 0 : i32
    return %c0_i32, %arg0 : i32, i32
  }
  func.func @transform_3(%arg0: i32) -> (i32, i32) {
    %c0_i32 = arith.constant 0 : i32
    %c0_i32_0 = arith.constant 0 : i32
    return %c0_i32, %arg0 : i32, i32
  }
}

module attributes {stable_mosaic.version = 11 : i64} {
  func.func @_cgemm_kernel(%arg0: i32, %arg1: memref<32x144xbf16, #tpu.memory_space<vmem>>, %arg2: memref<32x1xf32, #tpu.memory_space<vmem>>, %arg3: memref<144x128xbf16, #tpu.memory_space<vmem>>, %arg4: memref<32x128xf32, #tpu.memory_space<vmem>>) attributes {dimension_semantics = [#tpu.dimension_semantics<parallel>], iteration_bounds = array<i64: 1>, scalar_prefetch = 0 : i64, scratch_operands = 0 : i64, tpu.core_type = #tpu.core_type<tc>, window_params = [{pipeline_mode = #tpu.pipeline_mode<synchronous>, transform_indices = @transform_0, window_bounds = array<i64: 32, 144>}, {pipeline_mode = #tpu.pipeline_mode<synchronous>, transform_indices = @transform_1, window_bounds = array<i64: 32, 1>}, {transform_indices = @transform_2, window_bounds = array<i64: 144, 128>}, {transform_indices = @transform_3, window_bounds = array<i64: 32, 128>}]} {
    %c0 = arith.constant 0 : index
    %c0_0 = arith.constant 0 : index
    %0 = vector.load %arg1[%c0, %c0_0] : memref<32x144xbf16, #tpu.memory_space<vmem>>, vector<32x144xbf16>
    %c0_1 = arith.constant 0 : index
    %c0_2 = arith.constant 0 : index
    %1 = vector.load %arg3[%c0_1, %c0_2] : memref<144x128xbf16, #tpu.memory_space<vmem>>, vector<144x128xbf16>
    %cst = arith.constant dense<0.000000e+00> : vector<32x128xf32>
    %2 = tpu.matmul %0, %1, %cst {dimension_numbers = #tpu.dot_dimension_numbers<[1], [0], [0], [1], [0, 0, 1, 1], [], []>} : vector<32x144xbf16>, vector<144x128xbf16>, vector<32x128xf32> -> vector<32x128xf32>
    %c0_3 = arith.constant 0 : index
    %c0_4 = arith.constant 0 : index
    %3 = vector.load %arg2[%c0_3, %c0_4] : memref<32x1xf32, #tpu.memory_space<vmem>>, vector<32x1xf32>
    %4 = vector.broadcast %3 : vector<32x1xf32> to vector<32x128xf32>
    %5 = arith.addf %2, %4 : vector<32x128xf32>
    %cst_5 = arith.constant 0.000000e+00 : f32
    %6 = vector.broadcast %cst_5 : f32 to vector<32x128xf32>
    %7 = arith.maximumf %5, %6 : vector<32x128xf32>
    %c0_6 = arith.constant 0 : index
    %c0_7 = arith.constant 0 : index
    %8 = vector.load %arg4[%c0_6, %c0_7] : memref<32x128xf32, #tpu.memory_space<vmem>>, vector<32x128xf32>
    tpu.vector_store %arg4[%c0_6, %c0_7], %7 {strides = array<i32>} : memref<32x128xf32, #tpu.memory_space<vmem>>, vector<32x128xf32>,
    return
  }
  func.func @transform_0(%arg0: i32) -> (i32, i32) {
    %c0_i32 = arith.constant 0 : i32
    %c0_i32_0 = arith.constant 0 : i32
    %c0_i32_1 = arith.constant 0 : i32
    return %c0_i32, %c0_i32_0 : i32, i32
  }
  func.func @transform_1(%arg0: i32) -> (i32, i32) {
    %c0_i32 = arith.constant 0 : i32
    %c0_i32_0 = arith.constant 0 : i32
    %c0_i32_1 = arith.constant 0 : i32
    return %c0_i32, %c0_i32_0 : i32, i32
  }
  func.func @transform_2(%arg0: i32) -> (i32, i32) {
    %c0_i32 = arith.constant 0 : i32
    %c0_i32_0 = arith.constant 0 : i32
    return %c0_i32, %arg0 : i32, i32
  }
  func.func @transform_3(%arg0: i32) -> (i32, i32) {
    %c0_i32 = arith.constant 0 : i32
    %c0_i32_0 = arith.constant 0 : i32
    return %c0_i32, %arg0 : i32, i32
  }
}

module attributes {stable_mosaic.version = 11 : i64} {
  func.func @_cgemm_kernel(%arg0: i32, %arg1: memref<64x288xbf16, #tpu.memory_space<vmem>>, %arg2: memref<64x1xf32, #tpu.memory_space<vmem>>, %arg3: memref<288x128xbf16, #tpu.memory_space<vmem>>, %arg4: memref<64x128xf32, #tpu.memory_space<vmem>>) attributes {dimension_semantics = [#tpu.dimension_semantics<parallel>], iteration_bounds = array<i64: 1>, scalar_prefetch = 0 : i64, scratch_operands = 0 : i64, tpu.core_type = #tpu.core_type<tc>, window_params = [{pipeline_mode = #tpu.pipeline_mode<synchronous>, transform_indices = @transform_0, window_bounds = array<i64: 64, 288>}, {pipeline_mode = #tpu.pipeline_mode<synchronous>, transform_indices = @transform_1, window_bounds = array<i64: 64, 1>}, {transform_indices = @transform_2, window_bounds = array<i64: 288, 128>}, {transform_indices = @transform_3, window_bounds = array<i64: 64, 128>}]} {
    %c0 = arith.constant 0 : index
    %c0_0 = arith.constant 0 : index
    %0 = vector.load %arg1[%c0, %c0_0] : memref<64x288xbf16, #tpu.memory_space<vmem>>, vector<64x288xbf16>
    %c0_1 = arith.constant 0 : index
    %c0_2 = arith.constant 0 : index
    %1 = vector.load %arg3[%c0_1, %c0_2] : memref<288x128xbf16, #tpu.memory_space<vmem>>, vector<288x128xbf16>
    %cst = arith.constant dense<0.000000e+00> : vector<64x128xf32>
    %2 = tpu.matmul %0, %1, %cst {dimension_numbers = #tpu.dot_dimension_numbers<[1], [0], [0], [1], [0, 0, 1, 1], [], []>} : vector<64x288xbf16>, vector<288x128xbf16>, vector<64x128xf32> -> vector<64x128xf32>
    %c0_3 = arith.constant 0 : index
    %c0_4 = arith.constant 0 : index
    %3 = vector.load %arg2[%c0_3, %c0_4] : memref<64x1xf32, #tpu.memory_space<vmem>>, vector<64x1xf32>
    %4 = vector.broadcast %3 : vector<64x1xf32> to vector<64x128xf32>
    %5 = arith.addf %2, %4 : vector<64x128xf32>
    %cst_5 = arith.constant 0.000000e+00 : f32
    %6 = vector.broadcast %cst_5 : f32 to vector<64x128xf32>
    %7 = arith.maximumf %5, %6 : vector<64x128xf32>
    %c0_6 = arith.constant 0 : index
    %c0_7 = arith.constant 0 : index
    %8 = vector.load %arg4[%c0_6, %c0_7] : memref<64x128xf32, #tpu.memory_space<vmem>>, vector<64x128xf32>
    tpu.vector_store %arg4[%c0_6, %c0_7], %7 {strides = array<i32>} : memref<64x128xf32, #tpu.memory_space<vmem>>, vector<64x128xf32>,
    return
  }
  func.func @transform_0(%arg0: i32) -> (i32, i32) {
    %c0_i32 = arith.constant 0 : i32
    %c0_i32_0 = arith.constant 0 : i32
    %c0_i32_1 = arith.constant 0 : i32
    return %c0_i32, %c0_i32_0 : i32, i32
  }
  func.func @transform_1(%arg0: i32) -> (i32, i32) {
    %c0_i32 = arith.constant 0 : i32
    %c0_i32_0 = arith.constant 0 : i32
    %c0_i32_1 = arith.constant 0 : i32
    return %c0_i32, %c0_i32_0 : i32, i32
  }
  func.func @transform_2(%arg0: i32) -> (i32, i32) {
    %c0_i32 = arith.constant 0 : i32
    %c0_i32_0 = arith.constant 0 : i32
    return %c0_i32, %arg0 : i32, i32
  }
  func.func @transform_3(%arg0: i32) -> (i32, i32) {
    %c0_i32 = arith.constant 0 : i32
    %c0_i32_0 = arith.constant 0 : i32
    return %c0_i32, %arg0 : i32, i32
  }
}

module attributes {stable_mosaic.version = 11 : i64} {
  func.func @_cgemm_kernel(%arg0: i32, %arg1: memref<8x48xbf16, #tpu.memory_space<vmem>>, %arg2: memref<8x1xf32, #tpu.memory_space<vmem>>, %arg3: memref<48x128xbf16, #tpu.memory_space<vmem>>, %arg4: memref<4x128xf32, #tpu.memory_space<vmem>>, %arg5: memref<8x128xf32, #tpu.memory_space<vmem>>) attributes {dimension_semantics = [#tpu.dimension_semantics<parallel>], iteration_bounds = array<i64: 1>, scalar_prefetch = 0 : i64, scratch_operands = 0 : i64, tpu.core_type = #tpu.core_type<tc>, window_params = [{pipeline_mode = #tpu.pipeline_mode<synchronous>, transform_indices = @transform_0, window_bounds = array<i64: 8, 48>}, {pipeline_mode = #tpu.pipeline_mode<synchronous>, transform_indices = @transform_1, window_bounds = array<i64: 8, 1>}, {transform_indices = @transform_2, window_bounds = array<i64: 48, 128>}, {transform_indices = @transform_3, window_bounds = array<i64: 4, 128>}, {transform_indices = @transform_4, window_bounds = array<i64: 8, 128>}]} {
    %c0 = arith.constant 0 : index
    %c0_0 = arith.constant 0 : index
    %0 = vector.load %arg1[%c0, %c0_0] : memref<8x48xbf16, #tpu.memory_space<vmem>>, vector<8x48xbf16>
    %c0_1 = arith.constant 0 : index
    %c0_2 = arith.constant 0 : index
    %1 = vector.load %arg3[%c0_1, %c0_2] : memref<48x128xbf16, #tpu.memory_space<vmem>>, vector<48x128xbf16>
    %cst = arith.constant dense<0.000000e+00> : vector<8x128xf32>
    %2 = tpu.matmul %0, %1, %cst {dimension_numbers = #tpu.dot_dimension_numbers<[1], [0], [0], [1], [0, 0, 1, 1], [], []>} : vector<8x48xbf16>, vector<48x128xbf16>, vector<8x128xf32> -> vector<8x128xf32>
    %c0_3 = arith.constant 0 : index
    %c0_4 = arith.constant 0 : index
    %3 = vector.load %arg2[%c0_3, %c0_4] : memref<8x1xf32, #tpu.memory_space<vmem>>, vector<8x1xf32>
    %4 = vector.broadcast %3 : vector<8x1xf32> to vector<8x128xf32>
    %5 = arith.addf %2, %4 : vector<8x128xf32>
    %6 = vector.extract_strided_slice %5 {offsets = [0, 0], sizes = [1, 128], strides = [1, 1]} : vector<8x128xf32> to vector<1x128xf32>
    %7 = vector.extract_strided_slice %5 {offsets = [1, 0], sizes = [1, 128], strides = [1, 1]} : vector<8x128xf32> to vector<1x128xf32>
    %8 = arith.mulf %6, %6 : vector<1x128xf32>
    %9 = arith.mulf %7, %7 : vector<1x128xf32>
    %10 = arith.addf %8, %9 : vector<1x128xf32>
    %cst_5 = arith.constant 0.000000e+00 : f32
    %11 = vector.broadcast %cst_5 : f32 to vector<1x128xf32>
    %12 = arith.cmpf ogt, %10, %11 : vector<1x128xf32>
    %cst_6 = arith.constant 1.000000e+00 : f32
    %13 = vector.broadcast %cst_6 : f32 to vector<1x128xf32>
    %14 = arith.select %12, %10, %13 : vector<1x128xi1>, vector<1x128xf32>
    %15 = math.rsqrt %14 : vector<1x128xf32>
    %c0_7 = arith.constant 0 : index
    %c0_8 = arith.constant 0 : index
    %16 = vector.load %arg4[%c0_7, %c0_8] : memref<4x128xf32, #tpu.memory_space<vmem>>, vector<1x128xf32>
    %17 = arith.mulf %7, %15 : vector<1x128xf32>
    %cst_9 = arith.constant 1.000000e+00 : f32
    %18 = vector.broadcast %cst_9 : f32 to vector<1x128xf32>
    %19 = arith.select %12, %17, %18 : vector<1x128xi1>, vector<1x128xf32>
    %20 = arith.mulf %16, %19 : vector<1x128xf32>
    %c0_10 = arith.constant 0 : index
    %c0_11 = arith.constant 0 : index
    %21 = vector.load %arg5[%c0_10, %c0_11] : memref<8x128xf32, #tpu.memory_space<vmem>>, vector<1x128xf32>
    tpu.vector_store %arg5[%c0_10, %c0_11], %20 {strides = array<i32>} : memref<8x128xf32, #tpu.memory_space<vmem>>, vector<1x128xf32>,
    %22 = arith.mulf %6, %15 : vector<1x128xf32>
    %cst_12 = arith.constant 0.000000e+00 : f32
    %23 = vector.broadcast %cst_12 : f32 to vector<1x128xf32>
    %24 = arith.select %12, %22, %23 : vector<1x128xi1>, vector<1x128xf32>
    %25 = arith.mulf %16, %24 : vector<1x128xf32>
    %c1 = arith.constant 1 : index
    %c0_13 = arith.constant 0 : index
    %26 = vector.load %arg5[%c1, %c0_13] : memref<8x128xf32, #tpu.memory_space<vmem>>, vector<1x128xf32>
    tpu.vector_store %arg5[%c1, %c0_13], %25 {strides = array<i32>} : memref<8x128xf32, #tpu.memory_space<vmem>>, vector<1x128xf32>,
    %27 = vector.extract_strided_slice %5 {offsets = [2, 0], sizes = [1, 128], strides = [1, 1]} : vector<8x128xf32> to vector<1x128xf32>
    %28 = vector.extract_strided_slice %5 {offsets = [3, 0], sizes = [1, 128], strides = [1, 1]} : vector<8x128xf32> to vector<1x128xf32>
    %29 = arith.mulf %27, %27 : vector<1x128xf32>
    %30 = arith.mulf %28, %28 : vector<1x128xf32>
    %31 = arith.addf %29, %30 : vector<1x128xf32>
    %cst_14 = arith.constant 0.000000e+00 : f32
    %32 = vector.broadcast %cst_14 : f32 to vector<1x128xf32>
    %33 = arith.cmpf ogt, %31, %32 : vector<1x128xf32>
    %cst_15 = arith.constant 1.000000e+00 : f32
    %34 = vector.broadcast %cst_15 : f32 to vector<1x128xf32>
    %35 = arith.select %33, %31, %34 : vector<1x128xi1>, vector<1x128xf32>
    %36 = math.rsqrt %35 : vector<1x128xf32>
    %c1_16 = arith.constant 1 : index
    %c0_17 = arith.constant 0 : index
    %37 = vector.load %arg4[%c1_16, %c0_17] : memref<4x128xf32, #tpu.memory_space<vmem>>, vector<1x128xf32>
    %38 = arith.mulf %28, %36 : vector<1x128xf32>
    %cst_18 = arith.constant 1.000000e+00 : f32
    %39 = vector.broadcast %cst_18 : f32 to vector<1x128xf32>
    %40 = arith.select %33, %38, %39 : vector<1x128xi1>, vector<1x128xf32>
    %41 = arith.mulf %37, %40 : vector<1x128xf32>
    %c2 = arith.constant 2 : index
    %c0_19 = arith.constant 0 : index
    %42 = vector.load %arg5[%c2, %c0_19] : memref<8x128xf32, #tpu.memory_space<vmem>>, vector<1x128xf32>
    tpu.vector_store %arg5[%c2, %c0_19], %41 {strides = array<i32>} : memref<8x128xf32, #tpu.memory_space<vmem>>, vector<1x128xf32>,
    %43 = arith.mulf %27, %36 : vector<1x128xf32>
    %cst_20 = arith.constant 0.000000e+00 : f32
    %44 = vector.broadcast %cst_20 : f32 to vector<1x128xf32>
    %45 = arith.select %33, %43, %44 : vector<1x128xi1>, vector<1x128xf32>
    %46 = arith.mulf %37, %45 : vector<1x128xf32>
    %c3 = arith.constant 3 : index
    %c0_21 = arith.constant 0 : index
    %47 = vector.load %arg5[%c3, %c0_21] : memref<8x128xf32, #tpu.memory_space<vmem>>, vector<1x128xf32>
    tpu.vector_store %arg5[%c3, %c0_21], %46 {strides = array<i32>} : memref<8x128xf32, #tpu.memory_space<vmem>>, vector<1x128xf32>,
    %48 = vector.extract_strided_slice %5 {offsets = [4, 0], sizes = [1, 128], strides = [1, 1]} : vector<8x128xf32> to vector<1x128xf32>
    %49 = vector.extract_strided_slice %5 {offsets = [5, 0], sizes = [1, 128], strides = [1, 1]} : vector<8x128xf32> to vector<1x128xf32>
    %50 = arith.mulf %48, %48 : vector<1x128xf32>
    %51 = arith.mulf %49, %49 : vector<1x128xf32>
    %52 = arith.addf %50, %51 : vector<1x128xf32>
    %cst_22 = arith.constant 0.000000e+00 : f32
    %53 = vector.broadcast %cst_22 : f32 to vector<1x128xf32>
    %54 = arith.cmpf ogt, %52, %53 : vector<1x128xf32>
    %cst_23 = arith.constant 1.000000e+00 : f32
    %55 = vector.broadcast %cst_23 : f32 to vector<1x128xf32>
    %56 = arith.select %54, %52, %55 : vector<1x128xi1>, vector<1x128xf32>
    %57 = math.rsqrt %56 : vector<1x128xf32>
    %c2_24 = arith.constant 2 : index
    %c0_25 = arith.constant 0 : index
    %58 = vector.load %arg4[%c2_24, %c0_25] : memref<4x128xf32, #tpu.memory_space<vmem>>, vector<1x128xf32>
    %59 = arith.mulf %49, %57 : vector<1x128xf32>
    %cst_26 = arith.constant 1.000000e+00 : f32
    %60 = vector.broadcast %cst_26 : f32 to vector<1x128xf32>
    %61 = arith.select %54, %59, %60 : vector<1x128xi1>, vector<1x128xf32>
    %62 = arith.mulf %58, %61 : vector<1x128xf32>
    %c4 = arith.constant 4 : index
    %c0_27 = arith.constant 0 : index
    %63 = vector.load %arg5[%c4, %c0_27] : memref<8x128xf32, #tpu.memory_space<vmem>>, vector<1x128xf32>
    tpu.vector_store %arg5[%c4, %c0_27], %62 {strides = array<i32>} : memref<8x128xf32, #tpu.memory_space<vmem>>, vector<1x128xf32>,
    %64 = arith.mulf %48, %57 : vector<1x128xf32>
    %cst_28 = arith.constant 0.000000e+00 : f32
    %65 = vector.broadcast %cst_28 : f32 to vector<1x128xf32>
    %66 = arith.select %54, %64, %65 : vector<1x128xi1>, vector<1x128xf32>
    %67 = arith.mulf %58, %66 : vector<1x128xf32>
    %c5 = arith.constant 5 : index
    %c0_29 = arith.constant 0 : index
    %68 = vector.load %arg5[%c5, %c0_29] : memref<8x128xf32, #tpu.memory_space<vmem>>, vector<1x128xf32>
    tpu.vector_store %arg5[%c5, %c0_29], %67 {strides = array<i32>} : memref<8x128xf32, #tpu.memory_space<vmem>>, vector<1x128xf32>,
    %69 = vector.extract_strided_slice %5 {offsets = [6, 0], sizes = [1, 128], strides = [1, 1]} : vector<8x128xf32> to vector<1x128xf32>
    %70 = vector.extract_strided_slice %5 {offsets = [7, 0], sizes = [1, 128], strides = [1, 1]} : vector<8x128xf32> to vector<1x128xf32>
    %71 = arith.mulf %69, %69 : vector<1x128xf32>
    %72 = arith.mulf %70, %70 : vector<1x128xf32>
    %73 = arith.addf %71, %72 : vector<1x128xf32>
    %cst_30 = arith.constant 0.000000e+00 : f32
    %74 = vector.broadcast %cst_30 : f32 to vector<1x128xf32>
    %75 = arith.cmpf ogt, %73, %74 : vector<1x128xf32>
    %cst_31 = arith.constant 1.000000e+00 : f32
    %76 = vector.broadcast %cst_31 : f32 to vector<1x128xf32>
    %77 = arith.select %75, %73, %76 : vector<1x128xi1>, vector<1x128xf32>
    %78 = math.rsqrt %77 : vector<1x128xf32>
    %c3_32 = arith.constant 3 : index
    %c0_33 = arith.constant 0 : index
    %79 = vector.load %arg4[%c3_32, %c0_33] : memref<4x128xf32, #tpu.memory_space<vmem>>, vector<1x128xf32>
    %80 = arith.mulf %70, %78 : vector<1x128xf32>
    %cst_34 = arith.constant 1.000000e+00 : f32
    %81 = vector.broadcast %cst_34 : f32 to vector<1x128xf32>
    %82 = arith.select %75, %80, %81 : vector<1x128xi1>, vector<1x128xf32>
    %83 = arith.mulf %79, %82 : vector<1x128xf32>
    %c6 = arith.constant 6 : index
    %c0_35 = arith.constant 0 : index
    %84 = vector.load %arg5[%c6, %c0_35] : memref<8x128xf32, #tpu.memory_space<vmem>>, vector<1x128xf32>
    tpu.vector_store %arg5[%c6, %c0_35], %83 {strides = array<i32>} : memref<8x128xf32, #tpu.memory_space<vmem>>, vector<1x128xf32>,
    %85 = arith.mulf %69, %78 : vector<1x128xf32>
    %cst_36 = arith.constant 0.000000e+00 : f32
    %86 = vector.broadcast %cst_36 : f32 to vector<1x128xf32>
    %87 = arith.select %75, %85, %86 : vector<1x128xi1>, vector<1x128xf32>
    %88 = arith.mulf %79, %87 : vector<1x128xf32>
    %c7 = arith.constant 7 : index
    %c0_37 = arith.constant 0 : index
    %89 = vector.load %arg5[%c7, %c0_37] : memref<8x128xf32, #tpu.memory_space<vmem>>, vector<1x128xf32>
    tpu.vector_store %arg5[%c7, %c0_37], %88 {strides = array<i32>} : memref<8x128xf32, #tpu.memory_space<vmem>>, vector<1x128xf32>,
    return
  }
  func.func @transform_0(%arg0: i32) -> (i32, i32) {
    %c0_i32 = arith.constant 0 : i32
    %c0_i32_0 = arith.constant 0 : i32
    %c0_i32_1 = arith.constant 0 : i32
    return %c0_i32, %c0_i32_0 : i32, i32
  }
  func.func @transform_1(%arg0: i32) -> (i32, i32) {
    %c0_i32 = arith.constant 0 : i32
    %c0_i32_0 = arith.constant 0 : i32
    %c0_i32_1 = arith.constant 0 : i32
    return %c0_i32, %c0_i32_0 : i32, i32
  }
  func.func @transform_2(%arg0: i32) -> (i32, i32) {
    %c0_i32 = arith.constant 0 : i32
    %c0_i32_0 = arith.constant 0 : i32
    return %c0_i32, %arg0 : i32, i32
  }
  func.func @transform_3(%arg0: i32) -> (i32, i32) {
    %c0_i32 = arith.constant 0 : i32
    %c0_i32_0 = arith.constant 0 : i32
    return %c0_i32, %arg0 : i32, i32
  }
  func.func @transform_4(%arg0: i32) -> (i32, i32) {
    %c0_i32 = arith.constant 0 : i32
    %c0_i32_0 = arith.constant 0 : i32
    return %c0_i32, %arg0 : i32, i32
  }
}

module attributes {stable_mosaic.version = 11 : i64} {
  func.func @_cgemm_kernel(%arg0: i32, %arg1: memref<8x48xbf16, #tpu.memory_space<vmem>>, %arg2: memref<8x1xf32, #tpu.memory_space<vmem>>, %arg3: memref<48x128xbf16, #tpu.memory_space<vmem>>, %arg4: memref<8x128xf32, #tpu.memory_space<vmem>>) attributes {dimension_semantics = [#tpu.dimension_semantics<parallel>], iteration_bounds = array<i64: 1>, scalar_prefetch = 0 : i64, scratch_operands = 0 : i64, tpu.core_type = #tpu.core_type<tc>, window_params = [{pipeline_mode = #tpu.pipeline_mode<synchronous>, transform_indices = @transform_0, window_bounds = array<i64: 8, 48>}, {pipeline_mode = #tpu.pipeline_mode<synchronous>, transform_indices = @transform_1, window_bounds = array<i64: 8, 1>}, {transform_indices = @transform_2, window_bounds = array<i64: 48, 128>}, {transform_indices = @transform_3, window_bounds = array<i64: 8, 128>}]} {
    %c0 = arith.constant 0 : index
    %c0_0 = arith.constant 0 : index
    %0 = vector.load %arg1[%c0, %c0_0] : memref<8x48xbf16, #tpu.memory_space<vmem>>, vector<8x48xbf16>
    %c0_1 = arith.constant 0 : index
    %c0_2 = arith.constant 0 : index
    %1 = vector.load %arg3[%c0_1, %c0_2] : memref<48x128xbf16, #tpu.memory_space<vmem>>, vector<48x128xbf16>
    %cst = arith.constant dense<0.000000e+00> : vector<8x128xf32>
    %2 = tpu.matmul %0, %1, %cst {dimension_numbers = #tpu.dot_dimension_numbers<[1], [0], [0], [1], [0, 0, 1, 1], [], []>} : vector<8x48xbf16>, vector<48x128xbf16>, vector<8x128xf32> -> vector<8x128xf32>
    %c0_3 = arith.constant 0 : index
    %c0_4 = arith.constant 0 : index
    %3 = vector.load %arg2[%c0_3, %c0_4] : memref<8x1xf32, #tpu.memory_space<vmem>>, vector<8x1xf32>
    %4 = vector.broadcast %3 : vector<8x1xf32> to vector<8x128xf32>
    %5 = arith.addf %2, %4 : vector<8x128xf32>
    %c0_5 = arith.constant 0 : index
    %c0_6 = arith.constant 0 : index
    %6 = vector.load %arg4[%c0_5, %c0_6] : memref<8x128xf32, #tpu.memory_space<vmem>>, vector<8x128xf32>
    tpu.vector_store %arg4[%c0_5, %c0_6], %5 {strides = array<i32>} : memref<8x128xf32, #tpu.memory_space<vmem>>, vector<8x128xf32>,
    return
  }
  func.func @transform_0(%arg0: i32) -> (i32, i32) {
    %c0_i32 = arith.constant 0 : i32
    %c0_i32_0 = arith.constant 0 : i32
    %c0_i32_1 = arith.constant 0 : i32
    return %c0_i32, %c0_i32_0 : i32, i32
  }
  func.func @transform_1(%arg0: i32) -> (i32, i32) {
    %c0_i32 = arith.constant 0 : i32
    %c0_i32_0 = arith.constant 0 : i32
    %c0_i32_1 = arith.constant 0 : i32
    return %c0_i32, %c0_i32_0 : i32, i32
  }
  func.func @transform_2(%arg0: i32) -> (i32, i32) {
    %c0_i32 = arith.constant 0 : i32
    %c0_i32_0 = arith.constant 0 : i32
    return %c0_i32, %arg0 : i32, i32
  }
  func.func @transform_3(%arg0: i32) -> (i32, i32) {
    %c0_i32 = arith.constant 0 : i32
    %c0_i32_0 = arith.constant 0 : i32
    return %c0_i32, %arg0 : i32, i32
  }
}

</mosaic_0001>

<bundles_post_ra>
// kernel: custom-call
= control target key start
LH: loop header
LB: loop body
LE: loop exit
PB: predicated region body
PF: predicated region fallthrough
CT: control target
= control target key end

     0   :  { %2 = vsyncpa [#allocation0], 0  ;;  %s55_s0 = inlined_call_operand.hbm [shape: c64[1,1,16,16], index: 0, kind: input, shape index: {}]   ;;  %s56_s1 = inlined_call_operand.vmem [shape: f32[1,1,16,16], index: 1, kind: output, shape index: {}]  }
   0x1   :  { %s4_s8 = sshll.u32 %s55_s0, 4  ;;  %s6_s11 = sshll.u32 %s56_s1, 4  ;;  %s5_s8 = int_to_ptr.hbm [resolvable:$true] %s4_s8  ;;  %s7_s11 = int_to_ptr.vmem [resolvable:$true] %s6_s11 }
   0x2   :  { %9 = dma.hbm_to_vmem [thread:$0]  %s5_s8, 256, %s7_s11, [#allocation0] }
   0x3   :  { %37 = dma.done.wait [#allocation0], 256  }
   0x4   :  { %38 = vsyncadd [#allocation0], 4294967040 }
   0x5   :  { %12 = vsyncpa [#allocation0], 1 }

// kernel: custom-call.1
= control target key start
LH: loop header
LB: loop body
LE: loop exit
PB: predicated region body
PF: predicated region fallthrough
CT: control target
= control target key end

     0   :  { %s56_s0 = inlined_call_operand.hbm [shape: c64[1,1,16,16], index: 0, kind: input, shape index: {}]   ;;  %s57_s1 = inlined_call_operand.vmem [shape: f32[1,1,16,16], index: 1, kind: output, shape index: {}]  }
   0x1   :  { %s2_s8 = scalar_lea.hbm %s56_s0, 16 }
   0x2   :  { %3 = vsyncpa [#allocation0], 0  ;;  %s5_s9 = sshll.u32 %s2_s8, 4  ;;  %s7_s12 = sshll.u32 %s57_s1, 4  ;;  %s6_s9 = int_to_ptr.hbm [resolvable:$true] %s5_s9  ;;  %s8_s12 = int_to_ptr.vmem [resolvable:$true] %s7_s12 }
   0x3   :  { %10 = dma.hbm_to_vmem [thread:$0]  %s6_s9, 256, %s8_s12, [#allocation0] }
   0x4   :  { %38 = dma.done.wait [#allocation0], 256  }
   0x5   :  { %39 = vsyncadd [#allocation0], 4294967040 }
   0x6   :  { %13 = vsyncpa [#allocation0], 1 }

// kernel: proposednet_forward.14
= control target key start
LH: loop header
LB: loop body
LE: loop exit
PB: predicated region body
PF: predicated region fallthrough
CT: control target
= control target key end

     0   :  { %v74_v1 = vmov 0   ;;  %vm38_vm0 = vcmask 261120   ;;  %s110_s2 = inlined_call_operand.vmem [shape: bf16[32,128], index: 2, kind: input, shape index: {}]   ;;  %s111_s1 = inlined_call_operand.vmem [shape: f32[8,1], index: 1, kind: input, shape index: {}]   ;;  %s112_s0 = inlined_call_operand.vmem [shape: bf16[8,32], index: 0, kind: input, shape index: {}]   ;;  %s113_s3 = inlined_call_operand.vmem [shape: f32[8,128], index: 3, kind: output, shape index: {}]  }
   0x1   :  { %v71_v0 = vld [vmem:[%s110_s2 + $0x8] sm:$0xff]  ;;  %73 = vset.pattern.permute.xlu0 %v74_v1  ;;  %v20_v2 = vld [vmem:[%s111_s1] sm:$0xff] }
   0x2   :  { %48 = vmatpush.bf16.msra.mxu0 %v71_v0  ;;  %v70_v3 = vld [vmem:[%s110_s2] sm:$0xff]  ;;  %23 = vperm.xlu0 %73, %v20_v2  }
   0x3   :  { %v15_v4 = vld [vmem:[%s112_s0] sm:$0xf] }
   0x6   :  { %49 = vmatpush.bf16.msra.mxu0 %v70_v3 }
   0x9   :  { %69 = vmatmul.msk.bf16.vlgmr.msra.gmra.mxu0 %vm38_vm0, %v15_v4 }
  0x74   :  { %v24_v5 = vpop.permute.xlu0 %23 }
  0x86   :  { %v51_v6 = vpop.f32.mrf.mxu0 }
  0x87   :  { %v52_v7 = vadd.f32 %v51_v6, %v24_v5 }
  0x89   :  { %v55_v8 = vmax.f32 %v52_v7, 0.0 }
  0x8b   :  { %56 = vst [vmem:[%s113_s3] sm:$0xff] %v55_v8 }
  0x8e   :  { %v53_v9 = vpop.f32.mrf.mxu0 }

// kernel: proposednet_forward.15
= control target key start
LH: loop header
LB: loop body
LE: loop exit
PB: predicated region body
PF: predicated region fallthrough
CT: control target
= control target key end

     0   :  { %v87_v1 = vmov 0   ;;  %vm46_vm0 = vcmask 392192   ;;  %s126_s2 = inlined_call_operand.vmem [shape: bf16[48,128], index: 2, kind: input, shape index: {}]   ;;  %s127_s1 = inlined_call_operand.vmem [shape: f32[8,1], index: 1, kind: input, shape index: {}]   ;;  %s128_s0 = inlined_call_operand.vmem [shape: bf16[8,48], index: 0, kind: input, shape index: {}]   ;;  %s129_s3 = inlined_call_operand.vmem [shape: f32[8,128], index: 3, kind: output, shape index: {}]  }
   0x1   :  { %v84_v0 = vld [vmem:[%s126_s2 + $0x10] sm:$0xff]  ;;  %86 = vset.pattern.permute.xlu0 %v87_v1  ;;  %v22_v2 = vld [vmem:[%s127_s1] sm:$0xff]  ;;  %v83_v3 = vld [vmem:[%s126_s2 + $0x8] sm:$0xff] }
   0x2   :  { %55 = vmatpush.bf16.msra.mxu0 %v84_v0  ;;  %25 = vperm.xlu0 %86, %v22_v2   ;;  %v82_v4 = vld [vmem:[%s126_s2] sm:$0xff] }
   0x3   :  { %v15_v5 = vld [vmem:[%s128_s0] sm:$0xf] }
   0x6   :  { %56 = vmatpush.bf16.msra.mxu0 %v83_v3 }
   0xa   :  { %57 = vmatpush.bf16.msra.mxu0 %v82_v4 }
   0xd   :  { %81 = vmatmul.msk.bf16.vlgmr.msra.gmra.mxu0 %vm46_vm0, %v15_v5 }
  0x74   :  { %v26_v6 = vpop.permute.xlu0 %25 }
  0x8a   :  { %v59_v7 = vpop.f32.mrf.mxu0 }
  0x8b   :  { %v60_v8 = vadd.f32 %v59_v7, %v26_v6 }
  0x8d   :  { %v63_v9 = vmax.f32 %v60_v8, 0.0 }
  0x8f   :  { %64 = vst [vmem:[%s129_s3] sm:$0xff] %v63_v9 }
  0x92   :  { %v61_v10 = vpop.f32.mrf.mxu0 }

// kernel: proposednet_forward.16
= control target key start
LH: loop header
LB: loop body
LE: loop exit
PB: predicated region body
PF: predicated region fallthrough
CT: control target
= control target key end

     0   :  { %v133_v1 = vmov 0   ;;  %vm74_vm0 = vcmask 654336   ;;  %s184_s2 = inlined_call_operand.vmem [shape: bf16[80,128], index: 2, kind: input, shape index: {}]   ;;  %s185_s1 = inlined_call_operand.vmem [shape: f32[16,1], index: 1, kind: input, shape index: {}]   ;;  %s186_s0 = inlined_call_operand.vmem [shape: bf16[16,80], index: 0, kind: input, shape index: {}]   ;;  %s187_s3 = inlined_call_operand.vmem [shape: f32[16,128], index: 3, kind: output, shape index: {}]  }
   0x1   :  { %v130_v0 = vld [vmem:[%s184_s2 + $0x20] sm:$0xff]  ;;  %132 = vset.pattern.permute.xlu0 %v133_v1  ;;  %v129_v2 = vld [vmem:[%s184_s2 + $0x18] sm:$0xff]  ;;  %v128_v4 = vld [vmem:[%s184_s2 + $0x10] sm:$0xff] }
   0x2   :  { %81 = vmatpush.bf16.msra.mxu0 %v130_v0  ;;  %v27_v3 = vld [vmem:[%s185_s1] sm:$0xff]  ;;  %v28_v5 = vld [vmem:[%s185_s1 + $0x8] sm:$0xff] }
   0x3   :  { %31 = vperm.xlu0 %132, %v27_v3   ;;  %v127_v6 = vld [vmem:[%s184_s2 + $0x8] sm:$0xff]  ;;  %v126_v7 = vld [vmem:[%s184_s2] sm:$0xff] }
   0x4   :  { %v125_v8 = vld [vmem:[%s186_s0] sm:$0xff] }
   0x6   :  { %82 = vmatpush.bf16.msra.mxu0 %v129_v2 }
   0xa   :  { %83 = vmatpush.bf16.msra.mxu0 %v128_v4 }
   0xb   :  { %36 = vperm.xlu0 %132, %v28_v5  }
   0xe   :  { %84 = vmatpush.bf16.msra.mxu0 %v127_v6 }
  0x12   :  { %85 = vmatpush.bf16.msra.mxu0 %v126_v7 }
  0x15   :  { %124 = vmatmul.msk.bf16.vlgmr.msra.gmra.mxu0 %vm74_vm0, %v125_v8 }
  0x75   :  { %v32_v9 = vpop.permute.xlu0 %31 }
  0x7d   :  { %v37_v13 = vpop.permute.xlu0 %36 }
  0x92   :  { %v87_v10 = vpop.f32.mrf.mxu0 }
  0x93   :  { %v88_v11 = vadd.f32 %v87_v10, %v32_v9 }
  0x95   :  { %v92_v12 = vmax.f32 %v88_v11, 0.0 }
  0x97   :  { %94 = vst [vmem:[%s187_s3] sm:$0xff] %v92_v12 }
  0x9a   :  { %v89_v14 = vpop.f32.mrf.mxu0 }
  0x9b   :  { %v90_v15 = vadd.f32 %v89_v14, %v37_v13 }
  0x9d   :  { %v93_v16 = vmax.f32 %v90_v15, 0.0 }
  0x9f   :  { %95 = vst [vmem:[%s187_s3 + $0x8] sm:$0xff] %v93_v16 }

// kernel: proposednet_forward.17
= control target key start
LH: loop header
LB: loop body
LE: loop exit
PB: predicated region body
PF: predicated region fallthrough
CT: control target
= control target key end

     0   :  { %v268_v6 = vmov 0   ;;  %vm133_vm0 = vcmask 130048   ;;  %s366_s2 = inlined_call_operand.vmem [shape: bf16[144,128], index: 2, kind: input, shape index: {}]   ;;  %s367_s0 = inlined_call_operand.vmem [shape: bf16[32,144], index: 0, kind: input, shape index: {}]   ;;  %s368_s1 = inlined_call_operand.vmem [shape: f32[32,1], index: 1, kind: input, shape index: {}]   ;;  %s369_s3 = inlined_call_operand.vmem [shape: f32[32,128], index: 3, kind: output, shape index: {}]  }
   0x1   :  { %v255_v0 = vld [vmem:[%s366_s2 + $0x38] sm:$0xff]  ;;  %v256_v1 = vld [vmem:[%s366_s2 + $0x40] sm:$0xff]  ;;  %v254_v3 = vld [vmem:[%s366_s2 + $0x30] sm:$0xff]  ;;  %267 = vset.pattern.permute.xlu1 %v268_v6  ;;  %266 = vset.pattern.permute.xlu0 %v268_v6 }
   0x2   :  { %v244_v2 = vld [vmem:[%s367_s0 + $0x4] sm:$0xf]  ;;  %140 = vmatpush.bf16.msra.mxu0 %v255_v0  ;;  %257 = vmatpush.bf16.msra.mxu2 %v255_v0  ;;  %v194_v4 = vld [vmem:[%s367_s0 + $0x8] sm:$0xf0]  ;;  %v39_v7 = vld [vmem:[%s368_s1 + $0x10] sm:$0xff] }
   0x3   :  { %166 = vmatpush.bf16.msra.mxu1 %v256_v1  ;;  %v197_v5 = vor.u32 %v244_v2, %v194_v4  ;;  %v253_v8 = vld [vmem:[%s366_s2 + $0x28] sm:$0xff]  ;;  %v37_v9 = vld [vmem:[%s368_s1] sm:$0xff]  ;;  %53 = vperm.xlu1 %267, %v39_v7   ;;  %v40_v11 = vld [vmem:[%s368_s1 + $0x18] sm:$0xff] }
   0x4   :  { %43 = vperm.xlu0 %266, %v37_v9   ;;  %v252_v10 = vld [vmem:[%s366_s2 + $0x20] sm:$0xff]  ;;  %v38_v12 = vld [vmem:[%s368_s1 + $0x8] sm:$0xff]  ;;  %v251_v13 = vld [vmem:[%s366_s2 + $0x18] sm:$0xff] }
   0x5   :  { %v246_v14 = vld [vmem:[%s367_s0 + $0x14] sm:$0xf]  ;;  %v202_v15 = vld [vmem:[%s367_s0 + $0x18] sm:$0xf0]  ;;  %v249_v18 = vld [vmem:[%s366_s2 + $0x8] sm:$0xff] }
   0x6   :  { %141 = vmatpush.bf16.msra.mxu0 %v254_v3  ;;  %258 = vmatpush.bf16.msra.mxu2 %v254_v3  ;;  %v250_v16 = vld [vmem:[%s366_s2 + $0x10] sm:$0xff]  ;;  %v205_v17 = vor.u32 %v246_v14, %v202_v15  ;;  %v248_v19 = vld [vmem:[%s366_s2] sm:$0xff]  ;;  %v245_v21 = vld [vmem:[%s367_s0 + $0x4] sm:$0xf0] }
   0x7   :  { %242 = vmatmul.msk.bf16.vlgmr.msra.gmra.mxu1 %vm133_vm0, %v197_v5  ;;  %v192_v20 = vld [vmem:[%s367_s0] sm:$0xf]  ;;  %v200_v22 = vld [vmem:[%s367_s0 + $0x10] sm:$0xf]  ;;  %v247_v23 = vld [vmem:[%s367_s0 + $0x14] sm:$0xf0] }
   0x8   :  { %v193_v24 = vor.u32 %v245_v21, %v192_v20  ;;  %v201_v25 = vor.u32 %v247_v23, %v200_v22 }
   0xa   :  { %142 = vmatpush.bf16.msra.mxu0 %v253_v8  ;;  %259 = vmatpush.bf16.msra.mxu2 %v253_v8 }
   0xb   :  { %58 = vperm.xlu1 %267, %v40_v11  }
   0xc   :  { %48 = vperm.xlu0 %266, %v38_v12  }
   0xe   :  { %143 = vmatpush.bf16.msra.mxu0 %v252_v10  ;;  %260 = vmatpush.bf16.msra.mxu2 %v252_v10 }
  0x12   :  { %144 = vmatpush.bf16.msra.mxu0 %v251_v13  ;;  %261 = vmatpush.bf16.msra.mxu2 %v251_v13 }
  0x16   :  { %145 = vmatpush.bf16.msra.mxu0 %v250_v16  ;;  %262 = vmatpush.bf16.msra.mxu2 %v250_v16 }
  0x17   :  { %243 = vmatmul.msk.bf16.gmra.mxu1 %vm133_vm0, %v205_v17 }
  0x1a   :  { %146 = vmatpush.bf16.msra.mxu0 %v249_v18  ;;  %263 = vmatpush.bf16.msra.mxu2 %v249_v18 }
  0x1e   :  { %147 = vmatpush.bf16.msra.mxu0 %v248_v19  ;;  %264 = vmatpush.bf16.msra.mxu2 %v248_v19 }
  0x21   :  { %148 = vmatmul.bf16.vlgmr.msra.gmra.mxu0 %v193_v24  ;;  %153 = vmatmul.bf16.vlgmr.msra.gmra.mxu2 %v201_v25 }
  0x75   :  { %v54_v32 = vpop.permute.xlu1 %53 }
  0x76   :  { %v44_v28 = vpop.permute.xlu0 %43 }
  0x7d   :  { %v59_v44 = vpop.permute.xlu1 %58 }
  0x7e   :  { %v49_v37 = vpop.permute.xlu0 %48 }
  0x84   :  { %v168_v26 = vpop.f32.mrf.mxu1 }
  0x8c   :  { %v170_v27 = vpop.f32.mrf.mxu1 }
  0x94   :  { %v173_v34 = vpop.f32.mrf.mxu1 }
  0x9c   :  { %v175_v47 = vpop.f32.mrf.mxu1 }
  0x9e   :  { %v149_v29 = vpop.f32.mrf.mxu0 }
  0x9f   :  { %v150_v30 = vadd.f32 %v149_v29, %v44_v28 }
  0xa1   :  { %v169_v31 = vadd.f32 %v168_v26, %v150_v30 }
  0xa3   :  { %v178_v33 = vmax.f32 %v169_v31, 0.0 }
  0xa4   :  { %v154_v35 = vpop.f32.mrf.mxu2 }
  0xa5   :  { %182 = vst [vmem:[%s369_s3] sm:$0xff] %v178_v33  ;;  %v155_v36 = vadd.f32 %v154_v35, %v54_v32 }
  0xa6   :  { %v151_v38 = vpop.f32.mrf.mxu0 }
  0xa7   :  { %v174_v39 = vadd.f32 %v173_v34, %v155_v36  ;;  %v152_v40 = vadd.f32 %v151_v38, %v49_v37 }
  0xa9   :  { %v180_v41 = vmax.f32 %v174_v39, 0.0  ;;  %v171_v42 = vadd.f32 %v170_v27, %v152_v40 }
  0xab   :  { %184 = vst [vmem:[%s369_s3 + $0x10] sm:$0xff] %v180_v41  ;;  %v179_v43 = vmax.f32 %v171_v42, 0.0 }
  0xac   :  { %v156_v45 = vpop.f32.mrf.mxu2 }
  0xad   :  { %183 = vst [vmem:[%s369_s3 + $0x8] sm:$0xff] %v179_v43  ;;  %v157_v46 = vadd.f32 %v156_v45, %v59_v44 }
  0xaf   :  { %v176_v48 = vadd.f32 %v175_v47, %v157_v46 }
  0xb1   :  { %v181_v49 = vmax.f32 %v176_v48, 0.0 }
  0xb3   :  { %185 = vst [vmem:[%s369_s3 + $0x18] sm:$0xff] %v181_v49 }

// kernel: proposednet_forward.18
= control target key start
LH: loop header
LB: loop body
LE: loop exit
PB: predicated region body
PF: predicated region fallthrough
CT: control target
= control target key end

     0   :  { %vm283_vm0 = vcmask 261120   ;;  %v577_v15 = vmov 0   ;;  %s796_s2 = inlined_call_operand.vmem [shape: bf16[288,128], index: 2, kind: input, shape index: {}]   ;;  %s797_s0 = inlined_call_operand.vmem [shape: bf16[64,288], index: 0, kind: input, shape index: {}]   ;;  %s798_s1 = inlined_call_operand.vmem [shape: f32[64,1], index: 1, kind: input, shape index: {}]   ;;  %s799_s3 = inlined_call_operand.vmem [shape: f32[64,128], index: 3, kind: output, shape index: {}]  }
   0x1   :  { %v546_v0 = vld [vmem:[%s796_s2 + $0x38] sm:$0xff]  ;;  %v556_v2 = vld [vmem:[%s796_s2 + $0x88] sm:$0xff]  ;;  %v545_v3 = vld [vmem:[%s796_s2 + $0x30] sm:$0xff]  ;;  %575 = vset.pattern.permute.xlu1 %v577_v15  ;;  %574 = vset.pattern.permute.xlu0 %v577_v15 }
   0x2   :  { %v604_v1 = vld [vmem:[%s796_s2 + $0x78] sm:$0xff]  ;;  %296 = vmatpush.bf16.msra.mxu0 %v546_v0  ;;  %557 = vmatpush.bf16.msra.mxu3 %v546_v0  ;;  %v616_v4 = vld [vmem:[%s796_s2 + $0x70] sm:$0xff]  ;;  %v555_v5 = vld [vmem:[%s796_s2 + $0x80] sm:$0xff] }
   0x3   :  { %565 = vmatpush.bf16.msra.mxu1 %v604_v1  ;;  %360 = vmatpush.bf16.msra.mxu2 %v556_v2  ;;  %v413_v6 = vld [vmem:[%s797_s0 + $0x8] sm:$0xf]  ;;  %v529_v7 = vld [vmem:[%s797_s0 + $0x10] sm:$0xf0]  ;;  %v543_v11 = vld [vmem:[%s796_s2 + $0x20] sm:$0xff] }
   0x4   :  { %v544_v8 = vld [vmem:[%s796_s2 + $0x28] sm:$0xff]  ;;  %v414_v10 = vor.u32 %v529_v7, %v413_v6  ;;  %v644_v12 = vld [vmem:[%s796_s2 + $0x60] sm:$0xff]  ;;  %v542_v13 = vld [vmem:[%s796_s2 + $0x18] sm:$0xff]  ;;  %576 = vset.pattern.permute.xlu2 %v577_v15 }
   0x5   :  { %v634_v9 = vld [vmem:[%s796_s2 + $0x68] sm:$0xff]  ;;  %v653_v14 = vld [vmem:[%s796_s2 + $0x58] sm:$0xff]  ;;  %v541_v16 = vld [vmem:[%s796_s2 + $0x10] sm:$0xff] }
   0x6   :  { %297 = vmatpush.bf16.msra.mxu0 %v545_v3  ;;  %558 = vmatpush.bf16.msra.mxu3 %v545_v3  ;;  %v69_v17 = vld [vmem:[%s798_s1 + $0x10] sm:$0xff]  ;;  %v425_v19 = vld [vmem:[%s797_s0 + $0x20] sm:$0xf]  ;;  %v532_v20 = vld [vmem:[%s797_s0 + $0x28] sm:$0xf0] }
   0x7   :  { %566 = vmatpush.bf16.msra.mxu1 %v616_v4  ;;  %361 = vmatpush.bf16.msra.mxu2 %v555_v5  ;;  %v549_v18 = vld [vmem:[%s796_s2 + $0x50] sm:$0xff]  ;;  %v540_v21 = vld [vmem:[%s796_s2 + $0x8] sm:$0xff]  ;;  %v426_v23 = vor.u32 %v532_v20, %v425_v19  ;;  %v67_v24 = vld [vmem:[%s798_s1] sm:$0xff] }
   0x8   :  { %87 = vperm.xlu1 %575, %v69_v17   ;;  %v548_v22 = vld [vmem:[%s796_s2 + $0x48] sm:$0xff]  ;;  %77 = vperm.xlu0 %574, %v67_v24   ;;  %v539_v25 = vld [vmem:[%s796_s2] sm:$0xff]  ;;  %v417_v26 = vld [vmem:[%s797_s0 + $0x18] sm:$0xf] }
   0x9   :  { %v70_v27 = vld [vmem:[%s798_s1 + $0x18] sm:$0xff]  ;;  %v531_v28 = vld [vmem:[%s797_s0 + $0x20] sm:$0xf0]  ;;  %v405_v29 = vld [vmem:[%s797_s0] sm:$0xf] }
   0xa   :  { %298 = vmatpush.bf16.msra.mxu0 %v544_v8  ;;  %559 = vmatpush.bf16.msra.mxu3 %v544_v8  ;;  %v528_v30 = vld [vmem:[%s797_s0 + $0x8] sm:$0xf0]  ;;  %v547_v31 = vld [vmem:[%s796_s2 + $0x40] sm:$0xff]  ;;  %v530_v32 = vld [vmem:[%s797_s0 + $0x1c] sm:$0xf]  ;;  %v418_v34 = vor.u32 %v531_v28, %v417_v26 }
   0xb   :  { %567 = vmatpush.bf16.msra.mxu1 %v634_v9  ;;  %523 = vmatmul.msk.bf16.vlgmr.msra.gmra.mxu2 %vm283_vm0, %v414_v10  ;;  %v419_v33 = vld [vmem:[%s797_s0 + $0x24] sm:$0xf0]  ;;  %v406_v35 = vor.u32 %v528_v30, %v405_v29  ;;  %v74_v38 = vld [vmem:[%s798_s1 + $0x38] sm:$0xff]  ;;  %v71_v39 = vld [vmem:[%s798_s1 + $0x20] sm:$0xff] }
   0xc   :  { %v422_v36 = vor.u32 %v530_v32, %v419_v33  ;;  %v68_v37 = vld [vmem:[%s798_s1 + $0x8] sm:$0xff]  ;;  %v437_v40 = vld [vmem:[%s797_s0 + $0x38] sm:$0xf]  ;;  %v535_v41 = vld [vmem:[%s797_s0 + $0x40] sm:$0xf0]  ;;  %97 = vperm.xlu2 %576, %v71_v39  }
   0xd   :  { %v438_v42 = vor.u32 %v535_v41, %v437_v40  ;;  %v73_v43 = vld [vmem:[%s798_s1 + $0x30] sm:$0xff]  ;;  %v72_v44 = vld [vmem:[%s798_s1 + $0x28] sm:$0xff]  ;;  %v534_v46 = vld [vmem:[%s797_s0 + $0x38] sm:$0xf0] }
   0xe   :  { %299 = vmatpush.bf16.msra.mxu0 %v543_v11  ;;  %560 = vmatpush.bf16.msra.mxu3 %v543_v11  ;;  %v429_v45 = vld [vmem:[%s797_s0 + $0x30] sm:$0xf]  ;;  %v533_v47 = vld [vmem:[%s797_s0 + $0x34] sm:$0xf]  ;;  %v431_v48 = vld [vmem:[%s797_s0 + $0x3c] sm:$0xf0] }
   0xf   :  { %568 = vmatpush.bf16.msra.mxu1 %v644_v12  ;;  %v430_v49 = vor.u32 %v534_v46, %v429_v45  ;;  %v434_v50 = vor.u32 %v533_v47, %v431_v48  ;;  %v449_v51 = vld [vmem:[%s797_s0 + $0x50] sm:$0xf]  ;;  %v538_v52 = vld [vmem:[%s797_s0 + $0x58] sm:$0xf0]  ;;  %v527_v54 = vld [vmem:[%s797_s0 + $0x4] sm:$0xf] }
  0x10   :  { %92 = vperm.xlu1 %575, %v70_v27   ;;  %82 = vperm.xlu0 %574, %v68_v37   ;;  %v450_v53 = vor.u32 %v538_v52, %v449_v51  ;;  %v407_v55 = vld [vmem:[%s797_s0 + $0xc] sm:$0xf0]  ;;  %v441_v57 = vld [vmem:[%s797_s0 + $0x48] sm:$0xf]  ;;  %v537_v58 = vld [vmem:[%s797_s0 + $0x50] sm:$0xf0] }
  0x11   :  { %v410_v56 = vor.u32 %v527_v54, %v407_v55  ;;  %v536_v59 = vld [vmem:[%s797_s0 + $0x4c] sm:$0xf]  ;;  %v443_v60 = vld [vmem:[%s797_s0 + $0x54] sm:$0xf0]  ;;  %v442_v61 = vor.u32 %v537_v58, %v441_v57 }
  0x12   :  { %300 = vmatpush.bf16.msra.mxu0 %v542_v13  ;;  %561 = vmatpush.bf16.msra.mxu3 %v542_v13  ;;  %v446_v62 = vor.u32 %v536_v59, %v443_v60 }
  0x13   :  { %569 = vmatpush.bf16.msra.mxu1 %v653_v14 }
  0x14   :  { %102 = vperm.xlu2 %576, %v72_v44  }
  0x16   :  { %301 = vmatpush.bf16.msra.mxu0 %v541_v16  ;;  %562 = vmatpush.bf16.msra.mxu3 %v541_v16 }
  0x17   :  { %570 = vmatpush.bf16.msra.mxu1 %v549_v18 }
  0x18   :  { %112 = vperm.xlu1 %575, %v74_v38   ;;  %107 = vperm.xlu0 %574, %v73_v43  }
  0x1a   :  { %302 = vmatpush.bf16.msra.mxu0 %v540_v21  ;;  %563 = vmatpush.bf16.msra.mxu3 %v540_v21 }
  0x1b   :  { %571 = vmatpush.bf16.msra.mxu1 %v548_v22  ;;  %524 = vmatmul.msk.bf16.gmra.mxu2 %vm283_vm0, %v426_v23 }
  0x1e   :  { %303 = vmatpush.bf16.msra.mxu0 %v539_v25  ;;  %564 = vmatpush.bf16.msra.mxu3 %v539_v25 }
  0x1f   :  { %572 = vmatpush.bf16.msra.mxu1 %v547_v31 }
  0x21   :  { %309 = vmatmul.bf16.vlgmr.msra.gmra.mxu3 %v418_v34  ;;  %304 = vmatmul.bf16.vlgmr.msra.gmra.mxu0 %v406_v35 }
  0x22   :  { %325 = vmatpush.bf16.msrb.mxu0 %v604_v1  ;;  %338 = vmatmul.bf16.vlgmr.msra.gmra.mxu1 %v422_v36 }
  0x26   :  { %326 = vmatpush.bf16.msrb.mxu0 %v616_v4 }
  0x2a   :  { %327 = vmatpush.bf16.msrb.mxu0 %v634_v9 }
  0x2b   :  { %525 = vmatmul.msk.bf16.gmra.mxu2 %vm283_vm0, %v438_v42 }
  0x2e   :  { %328 = vmatpush.bf16.msrb.mxu0 %v644_v12 }
  0x31   :  { %314 = vmatmul.bf16.gmra.mxu3 %v430_v49 }
  0x32   :  { %329 = vmatpush.bf16.msrb.mxu0 %v653_v14  ;;  %343 = vmatmul.bf16.gmra.mxu1 %v434_v50 }
  0x36   :  { %330 = vmatpush.bf16.msrb.mxu0 %v549_v18 }
  0x3a   :  { %331 = vmatpush.bf16.msrb.mxu0 %v548_v22 }
  0x3b   :  { %526 = vmatmul.msk.bf16.gmra.mxu2 %vm283_vm0, %v450_v53 }
  0x3e   :  { %332 = vmatpush.bf16.msrb.mxu0 %v547_v31 }
  0x41   :  { %333 = vmatmul.bf16.vlgmr.msrb.gmra.mxu0 %v410_v56  ;;  %319 = vmatmul.bf16.gmra.mxu3 %v442_v61 }
  0x42   :  { %348 = vmatmul.bf16.gmra.mxu1 %v446_v62 }
  0x66   :  { %v98_v18 = vpop.permute.xlu2 %97 }
  0x6e   :  { %v103_v30 = vpop.permute.xlu2 %102 }
  0x7a   :  { %v88_v3 = vpop.permute.xlu1 %87  ;;  %v78_v15 = vpop.permute.xlu0 %77 }
  0x82   :  { %v93_v11 = vpop.permute.xlu1 %92  ;;  %v83_v26 = vpop.permute.xlu0 %82 }
  0x8a   :  { %v108_v42 = vpop.permute.xlu0 %107  ;;  %v113_v55 = vpop.permute.xlu1 %112 }
  0x8e   :  { %v363_v63 = vpop.f32.mrf.mxu2 }
  0x96   :  { %v365_v0 = vpop.f32.mrf.mxu2 }
  0x9e   :  { %v368_v1 = vpop.f32.mrf.mxu2  ;;  %v305_v8 = vpop.f32.mrf.mxu0 }
  0x9f   :  { %v339_v2 = vpop.f32.mrf.mxu1  ;;  %v306_v28 = vadd.f32 %v305_v8, %v78_v15 }
  0xa4   :  { %v310_v4 = vpop.f32.mrf.mxu3 }
  0xa5   :  { %v311_v5 = vadd.f32 %v310_v4, %v88_v3 }
  0xa6   :  { %v370_v9 = vpop.f32.mrf.mxu2  ;;  %v307_v20 = vpop.f32.mrf.mxu0 }
  0xa7   :  { %v340_v6 = vadd.f32 %v339_v2, %v311_v5  ;;  %v341_v7 = vpop.f32.mrf.mxu1  ;;  %v308_v41 = vadd.f32 %v307_v20, %v83_v26 }
  0xa9   :  { %v369_v10 = vadd.f32 %v368_v1, %v340_v6 }
  0xab   :  { %v385_v12 = vmax.f32 %v369_v10, 0.0 }
  0xac   :  { %v312_v13 = vpop.f32.mrf.mxu3 }
  0xad   :  { %393 = vst [vmem:[%s799_s3 + $0x10] sm:$0xff] %v385_v12  ;;  %v313_v14 = vadd.f32 %v312_v13, %v93_v11 }
  0xae   :  { %v373_v21 = vpop.f32.mrf.mxu2 }
  0xaf   :  { %v342_v16 = vadd.f32 %v341_v7, %v313_v14  ;;  %v344_v17 = vpop.f32.mrf.mxu1 }
  0xb1   :  { %v371_v19 = vadd.f32 %v370_v9, %v342_v16 }
  0xb3   :  { %v386_v22 = vmax.f32 %v371_v19, 0.0 }
  0xb4   :  { %v315_v23 = vpop.f32.mrf.mxu3 }
  0xb5   :  { %394 = vst [vmem:[%s799_s3 + $0x18] sm:$0xff] %v386_v22  ;;  %v316_v24 = vadd.f32 %v315_v23, %v98_v18 }
  0xb6   :  { %v375_v33 = vpop.f32.mrf.mxu2 }
  0xb7   :  { %v345_v25 = vadd.f32 %v344_v17, %v316_v24  ;;  %v346_v29 = vpop.f32.mrf.mxu1 }
  0xb9   :  { %v374_v27 = vadd.f32 %v373_v21, %v345_v25 }
  0xbb   :  { %v387_v31 = vmax.f32 %v374_v27, 0.0 }
  0xbc   :  { %v317_v35 = vpop.f32.mrf.mxu3 }
  0xbd   :  { %395 = vst [vmem:[%s799_s3 + $0x20] sm:$0xff] %v387_v31  ;;  %v318_v36 = vadd.f32 %v317_v35, %v103_v30 }
  0xbe   :  { %v334_v32 = vpop.f32.mrf.mxu0  ;;  %v378_v49 = vpop.f32.mrf.mxu2 }
  0xbf   :  { %v335_v34 = vadd.f32 %v334_v32, %v306_v28  ;;  %v347_v38 = vadd.f32 %v346_v29, %v318_v36  ;;  %v349_v45 = vpop.f32.mrf.mxu1 }
  0xc1   :  { %v364_v37 = vadd.f32 %v363_v63, %v335_v34  ;;  %v376_v40 = vadd.f32 %v375_v33, %v347_v38 }
  0xc3   :  { %v383_v39 = vmax.f32 %v364_v37, 0.0  ;;  %v388_v43 = vmax.f32 %v376_v40, 0.0 }
  0xc4   :  { %v320_v47 = vpop.f32.mrf.mxu3 }
  0xc5   :  { %391 = vst [vmem:[%s799_s3] sm:$0xff] %v383_v39  ;;  %v321_v48 = vadd.f32 %v320_v47, %v108_v42 }
  0xc6   :  { %v336_v44 = vpop.f32.mrf.mxu0  ;;  %396 = vst [vmem:[%s799_s3 + $0x28] sm:$0xff] %v388_v43  ;;  %v380_v60 = vpop.f32.mrf.mxu2 }
  0xc7   :  { %v337_v46 = vadd.f32 %v336_v44, %v308_v41  ;;  %v350_v51 = vadd.f32 %v349_v45, %v321_v48  ;;  %v351_v58 = vpop.f32.mrf.mxu1 }
  0xc9   :  { %v366_v50 = vadd.f32 %v365_v0, %v337_v46  ;;  %v379_v53 = vadd.f32 %v378_v49, %v350_v51 }
  0xcb   :  { %v384_v52 = vmax.f32 %v366_v50, 0.0  ;;  %v389_v54 = vmax.f32 %v379_v53, 0.0 }
  0xcc   :  { %v322_v56 = vpop.f32.mrf.mxu3 }
  0xcd   :  { %392 = vst [vmem:[%s799_s3 + $0x8] sm:$0xff] %v384_v52  ;;  %v323_v57 = vadd.f32 %v322_v56, %v113_v55 }
  0xce   :  { %397 = vst [vmem:[%s799_s3 + $0x30] sm:$0xff] %v389_v54 }
  0xcf   :  { %v352_v59 = vadd.f32 %v351_v58, %v323_v57 }
  0xd1   :  { %v381_v61 = vadd.f32 %v380_v60, %v352_v59 }
  0xd3   :  { %v390_v62 = vmax.f32 %v381_v61, 0.0 }
  0xd5   :  { %398 = vst [vmem:[%s799_s3 + $0x38] sm:$0xff] %v390_v62 }

// kernel: squeeze.8
= control target key start
LH: loop header
LB: loop body
LE: loop exit
PB: predicated region body
PF: predicated region fallthrough
CT: control target
= control target key end

     0   :  { %vm4_vm0 = vcmask 1047556   ;;  %s209_s14 = smov 12   ;;  %s210_s15 = smov 14   ;;  %vm6_vm1 = vcmask 15360   ;;  %vm25_vm2 = vcmask 130160   ;;  %vm46_vm3 = vcmask 113760   ;;  %s386_s0 = inlined_call_operand.vmem [shape: f32[1,8,2,8,2], index: 0, kind: input, shape index: {}]   ;;  %s387_s1 = inlined_call_operand.vmem [shape: f32[16,16], index: 1, kind: output, shape index: {}]  }
   0x1   :  { %v172_v0 = vld [vmem:[%s386_s0 + $0x6] ss:$8 sm:$0xf]   ;;  %v167_v3 = vld [vmem:[%s386_s0 + $0x7] ss:$8 sm:$0xf]  }
   0x2   :  { %v173_v1 = vld [vmem:[%s386_s0 + $0x6] ss:$8 sm:$0xf0]   ;;  %v168_v4 = vld [vmem:[%s386_s0 + $0x7] ss:$8 sm:$0xf0]  }
   0x3   :  { %v43_v2 = vsel %vm4_vm0, %v173_v1, %v172_v0  ;;  %v22_v5 = vsel %vm4_vm0, %v168_v4, %v167_v3  ;;  %v174_v6 = vld [vmem:[%s386_s0 + $0x46] ss:$8 sm:$0xf]   ;;  %v169_v8 = vld [vmem:[%s386_s0 + $0x47] ss:$8 sm:$0xf]  }
   0x4   :  { %44 = vrot.lane.b32.xlu1 %v43_v2, %s209_s14  ;;  %23 = vrot.lane.b32.xlu0 %v22_v5, %s210_s15  ;;  %v175_v7 = vld [vmem:[%s386_s0 + $0x46] ss:$8 sm:$0xf0]   ;;  %v170_v9 = vld [vmem:[%s386_s0 + $0x47] ss:$8 sm:$0xf0]  }
   0x5   :  { %v53_v10 = vsel %vm4_vm0, %v175_v7, %v174_v6  ;;  %v32_v11 = vsel %vm4_vm0, %v170_v9, %v169_v8  ;;  %v177_v12 = vld [vmem:[%s386_s0 + $0x5] ss:$8 sm:$0xf]   ;;  %v184_v15 = vld [vmem:[%s386_s0 + $0x44] ss:$8 sm:$0xf]  }
   0x6   :  { %v178_v13 = vld [vmem:[%s386_s0 + $0x5] ss:$8 sm:$0xf0]   ;;  %v185_v16 = vld [vmem:[%s386_s0 + $0x44] ss:$8 sm:$0xf0]  }
   0x7   :  { %v64_v14 = vsel %vm4_vm0, %v178_v13, %v177_v12  ;;  %s211_s3 = smov 10   ;;  %v182_v17 = vld [vmem:[%s386_s0 + $0x4] ss:$8 sm:$0xf]   ;;  %v95_v21 = vsel %vm4_vm0, %v185_v16, %v184_v15  ;;  %s212_s12 = smov 8   ;;  %vm67_vm4 = vcmask 97360  }
   0x8   :  { %65 = vrot.lane.b32.xlu2 %v64_v14, %s211_s3  ;;  %v183_v18 = vld [vmem:[%s386_s0 + $0x4] ss:$8 sm:$0xf0]   ;;  %v179_v19 = vld [vmem:[%s386_s0 + $0x45] ss:$8 sm:$0xf]  }
   0x9   :  { %v180_v20 = vld [vmem:[%s386_s0 + $0x45] ss:$8 sm:$0xf0]   ;;  %v85_v22 = vsel %vm4_vm0, %v183_v18, %v182_v17  ;;  %v192_v24 = vld [vmem:[%s386_s0 + $0x2] ss:$8 sm:$0xf]  }
   0xa   :  { %v74_v23 = vsel %vm4_vm0, %v180_v20, %v179_v19  ;;  %v193_v25 = vld [vmem:[%s386_s0 + $0x2] ss:$8 sm:$0xf0]   ;;  %v189_v26 = vld [vmem:[%s386_s0 + $0x43] ss:$8 sm:$0xf]  }
   0xb   :  { %v190_v27 = vld [vmem:[%s386_s0 + $0x43] ss:$8 sm:$0xf0]   ;;  %v127_v30 = vsel %vm4_vm0, %v193_v25, %v192_v24  ;;  %s213_s25 = smov 4   ;;  %s214_s26 = smov 6   ;;  %vm88_vm5 = vcmask 80960  }
   0xc   :  { %54 = vrot.lane.b32.xlu1 %v53_v10, %s209_s14  ;;  %33 = vrot.lane.b32.xlu0 %v32_v11, %s210_s15  ;;  %v187_v28 = vld [vmem:[%s386_s0 + $0x3] ss:$8 sm:$0xf]   ;;  %v116_v31 = vsel %vm4_vm0, %v190_v27, %v189_v26  ;;  %v199_v33 = vld [vmem:[%s386_s0 + $0x41] ss:$8 sm:$0xf]  }
   0xd   :  { %v188_v29 = vld [vmem:[%s386_s0 + $0x3] ss:$8 sm:$0xf0]   ;;  %v200_v34 = vld [vmem:[%s386_s0 + $0x41] ss:$8 sm:$0xf0]  }
   0xe   :  { %v106_v32 = vsel %vm4_vm0, %v188_v29, %v187_v28  ;;  %v197_v35 = vld [vmem:[%s386_s0 + $0x1] ss:$8 sm:$0xf]   ;;  %v194_v37 = vld [vmem:[%s386_s0 + $0x42] ss:$8 sm:$0xf]   ;;  %v158_v39 = vsel %vm4_vm0, %v200_v34, %v199_v33 }
   0xf   :  { %v198_v36 = vld [vmem:[%s386_s0 + $0x1] ss:$8 sm:$0xf0]   ;;  %v195_v38 = vld [vmem:[%s386_s0 + $0x42] ss:$8 sm:$0xf0]  }
  0x10   :  { %75 = vrot.lane.b32.xlu2 %v74_v23, %s211_s3  ;;  %v148_v40 = vsel %vm4_vm0, %v198_v36, %v197_v35  ;;  %v137_v41 = vsel %vm4_vm0, %v195_v38, %v194_v37  ;;  %s215_s10 = smov 2   ;;  %v2_v42 = vld [vmem:[%s386_s0] ss:$8 sm:$0xf]   ;;  %vm109_vm6 = vcmask 64560   ;;  %vm130_vm7 = vcmask 48160  }
  0x11   :  { %v3_v43 = vld [vmem:[%s386_s0] ss:$8 sm:$0xf0]   ;;  %vm151_vm8 = vcmask 31760  }
  0x12   :  { %v5_v44 = vsel %vm4_vm0, %v3_v43, %v2_v42  ;;  %v164_v45 = vld [vmem:[%s386_s0 + $0x40] ss:$8 sm:$0xf]  }
  0x13   :  { %7 = vst.msk [vmem:[%s387_s1] sm:$0xff] %vm6_vm1, %v5_v44   ;;  %v165_v46 = vld [vmem:[%s386_s0 + $0x40] ss:$8 sm:$0xf0]  }
  0x14   :  { %96 = vrot.lane.b32.xlu1 %v95_v21, %s212_s12  ;;  %86 = vrot.lane.b32.xlu0 %v85_v22, %s212_s12  ;;  %v13_v47 = vsel %vm4_vm0, %v165_v46, %v164_v45 }
  0x15   :  { %166 = vst.msk [vmem:[%s387_s1 + $0x8] sm:$0xff] %vm6_vm1, %v13_v47  }
  0x18   :  { %107 = vrot.lane.b32.xlu2 %v106_v32, %s214_s26 }
  0x1c   :  { %128 = vrot.lane.b32.xlu1 %v127_v30, %s213_s25  ;;  %117 = vrot.lane.b32.xlu0 %v116_v31, %s214_s26 }
  0x20   :  { %138 = vrot.lane.b32.xlu2 %v137_v41, %s213_s25 }
  0x24   :  { %159 = vrot.lane.b32.xlu1 %v158_v39, %s215_s10  ;;  %149 = vrot.lane.b32.xlu0 %v148_v40, %s215_s10 }
  0x62   :  { %v66_v48 = vpop.permute.xlu2 %65  }
  0x6a   :  { %v76_v49 = vpop.permute.xlu2 %75  }
  0x72   :  { %v108_v52 = vpop.permute.xlu2 %107  }
  0x76   :  { %v45_v50 = vpop.permute.xlu1 %44   ;;  %v24_v51 = vpop.permute.xlu0 %23  }
  0x77   :  { %26 = vst.msk [vmem:[%s387_s1] sm:$0xff] %vm25_vm2, %v24_v51  }
  0x78   :  { %47 = vst.msk [vmem:[%s387_s1] sm:$0xff] %vm46_vm3, %v45_v50  }
  0x79   :  { %68 = vst.msk [vmem:[%s387_s1] sm:$0xff] %vm67_vm4, %v66_v48  }
  0x7a   :  { %v139_v55 = vpop.permute.xlu2 %138  }
  0x7e   :  { %v55_v53 = vpop.permute.xlu1 %54   ;;  %v34_v54 = vpop.permute.xlu0 %33  }
  0x7f   :  { %171 = vst.msk [vmem:[%s387_s1 + $0x8] sm:$0xff] %vm25_vm2, %v34_v54  }
  0x80   :  { %176 = vst.msk [vmem:[%s387_s1 + $0x8] sm:$0xff] %vm46_vm3, %v55_v53  }
  0x81   :  { %181 = vst.msk [vmem:[%s387_s1 + $0x8] sm:$0xff] %vm67_vm4, %v76_v49  }
  0x86   :  { %v97_v56 = vpop.permute.xlu1 %96   ;;  %v87_v57 = vpop.permute.xlu0 %86  }
  0x87   :  { %186 = vst.msk [vmem:[%s387_s1 + $0x8] sm:$0xff] %vm88_vm5, %v97_v56  }
  0x88   :  { %89 = vst.msk [vmem:[%s387_s1] sm:$0xff] %vm88_vm5, %v87_v57  }
  0x89   :  { %110 = vst.msk [vmem:[%s387_s1] sm:$0xff] %vm109_vm6, %v108_v52  }
  0x8e   :  { %v129_v58 = vpop.permute.xlu1 %128   ;;  %v118_v59 = vpop.permute.xlu0 %117  }
  0x8f   :  { %131 = vst.msk [vmem:[%s387_s1] sm:$0xff] %vm130_vm7, %v129_v58  }
  0x90   :  { %191 = vst.msk [vmem:[%s387_s1 + $0x8] sm:$0xff] %vm109_vm6, %v118_v59  }
  0x91   :  { %196 = vst.msk [vmem:[%s387_s1 + $0x8] sm:$0xff] %vm130_vm7, %v139_v55  }
  0x96   :  { %v160_v60 = vpop.permute.xlu1 %159   ;;  %v150_v61 = vpop.permute.xlu0 %149  }
  0x97   :  { %201 = vst.msk [vmem:[%s387_s1 + $0x8] sm:$0xff] %vm151_vm8, %v160_v60  }
  0x98   :  { %152 = vst.msk [vmem:[%s387_s1] sm:$0xff] %vm151_vm8, %v150_v61  }

// kernel: proposednet_forward.21
= control target key start
LH: loop header
LB: loop body
LE: loop exit
PB: predicated region body
PF: predicated region fallthrough
CT: control target
= control target key end

     0   :  { %v151_v1 = vmov 0   ;;  %vm49_vm0 = vcmask 392192   ;;  %s231_s2 = inlined_call_operand.vmem [shape: bf16[48,128], index: 2, kind: input, shape index: {}]   ;;  %s232_s1 = inlined_call_operand.vmem [shape: f32[8,1], index: 1, kind: input, shape index: {}]   ;;  %s233_s0 = inlined_call_operand.vmem [shape: bf16[8,48], index: 0, kind: input, shape index: {}]   ;;  %s234_s3 = inlined_call_operand.vmem [shape: f32[4,128], index: 3, kind: input, shape index: {}]   ;;  %s235_s4 = inlined_call_operand.vmem [shape: f32[8,128], index: 4, kind: output, shape index: {}]  }
   0x1   :  { %v146_v0 = vld [vmem:[%s231_s2 + $0x10] sm:$0xff]  ;;  %148 = vset.pattern.permute.xlu0 %v151_v1  ;;  %v25_v2 = vld [vmem:[%s232_s1] sm:$0xff]  ;;  %v145_v3 = vld [vmem:[%s231_s2 + $0x8] sm:$0xff] }
   0x2   :  { %58 = vmatpush.bf16.msra.mxu0 %v146_v0  ;;  %28 = vperm.xlu0 %148, %v25_v2   ;;  %v144_v4 = vld [vmem:[%s231_s2] sm:$0xff] }
   0x3   :  { %v18_v5 = vld [vmem:[%s233_s0] sm:$0xf] }
   0x4   :  { %v83_v21 = vld [vmem:[%s234_s3] sm:$0x1]  ;;  %v98_v26 = vld [vmem:[%s234_s3 + $0x1] sm:$0x1]  ;;  %v109_v27 = vld [vmem:[%s234_s3 + $0x2] sm:$0x1] }
   0x5   :  { %v118_v31 = vld [vmem:[%s234_s3 + $0x3] sm:$0x1] }
   0x6   :  { %59 = vmatpush.bf16.msra.mxu0 %v145_v3 }
   0xa   :  { %60 = vmatpush.bf16.msra.mxu0 %v144_v4 }
   0xd   :  { %143 = vmatmul.msk.bf16.vlgmr.msra.gmra.mxu0 %vm49_vm0, %v18_v5 }
  0x74   :  { %v29_v6 = vpop.permute.xlu0 %28 }
  0x8a   :  { %v62_v7 = vpop.f32.mrf.mxu0 }
  0x8b   :  { %v63_v8 = vadd.f32 %v62_v7, %v29_v6 }
  0x8d   :  { %v66_v9 = vmul.f32 %v63_v8, %v63_v8 }
  0x8f   :  { %v68_v10 = vrot.slane %v66_v9, 1 }
  0x91   :  { %v70_v11 = vadd.f32 %v68_v10, %v66_v9 }
  0x92   :  { %v64_v12 = vpop.f32.mrf.mxu0 }
  0x93   :  { %vm71_vm1 = vcmp.gt.f32.partialorder %v70_v11, 0.0 }
  0x94   :  { %v72_v13 = vsel %vm71_vm1, %v70_v11, 1.0 }
  0x95   :  { %149 = vrsqrt.f32 %v72_v13  ;;  %vm79_vm3 = vweird.f32 %v72_v13 }
  0x9b   :  { %v150_v14 = vpop.eup %149 }
  0x9c   :  { %v74_v15 = vmul.f32 %v150_v14, %v72_v13  ;;  %vm80_vm2 = vweird.f32 %v150_v14 }
  0x9d   :  { %vm81_vm4 = vmor %vm79_vm3, %vm80_vm2 }
  0x9e   :  { %v75_v16 = vmul.f32 %v150_v14, %v74_v15 }
  0xa0   :  { %v76_v17 = vmul.f32 0.5, %v75_v16 }
  0xa2   :  { %v77_v18 = vsub.f32 1.5, %v76_v17 }
  0xa4   :  { %v78_v19 = vmul.f32 %v150_v14, %v77_v18 }
  0xa6   :  { %v82_v20 = vsel %vm81_vm4, %v150_v14, %v78_v19 }
  0xa7   :  { %v85_v22 = vrot.slane %v82_v20, 7  ;;  %v94_v23 = vmul.f32 %v82_v20, %v63_v8 }
  0xa9   :  { %v87_v24 = vmul.f32 %v85_v22, %v63_v8  ;;  %v95_v25 = vsel %vm71_vm1, %v94_v23, 0.0 }
  0xaa   :  { %v96_v28 = vmul.f32 %v95_v25, %v83_v21  ;;  %v105_v29 = vrot.slane %v95_v25, 2  ;;  %v114_v30 = vrot.slane %v95_v25, 4  ;;  %v123_v32 = vrot.slane %v95_v25, 6 }
  0xab   :  { %v89_v33 = vrot.slane %v87_v24, 1 }
  0xac   :  { %97 = vst [vmem:[%s235_s4 + $0x1] sm:$0x1] %v96_v28  ;;  %v107_v34 = vmul.f32 %v105_v29, %v98_v26  ;;  %v116_v35 = vmul.f32 %v114_v30, %v109_v27  ;;  %v125_v37 = vmul.f32 %v123_v32, %v118_v31 }
  0xad   :  { %v91_v36 = vsel %vm71_vm1, %v89_v33, 1.0 }
  0xae   :  { %v92_v38 = vmul.f32 %v91_v36, %v83_v21  ;;  %v100_v39 = vrot.slane %v91_v36, 2  ;;  %108 = vst [vmem:[%s235_s4 + $0x3] sm:$0x1] %v107_v34  ;;  %v110_v40 = vrot.slane %v91_v36, 4  ;;  %v119_v41 = vrot.slane %v91_v36, 6 }
  0xaf   :  { %117 = vst [vmem:[%s235_s4 + $0x5] sm:$0x1] %v116_v35 }
  0xb0   :  { %93 = vst [vmem:[%s235_s4] sm:$0x1] %v92_v38  ;;  %v102_v42 = vmul.f32 %v100_v39, %v98_v26  ;;  %v112_v43 = vmul.f32 %v110_v40, %v109_v27  ;;  %v121_v44 = vmul.f32 %v119_v41, %v118_v31 }
  0xb1   :  { %126 = vst [vmem:[%s235_s4 + $0x7] sm:$0x1] %v125_v37 }
  0xb2   :  { %103 = vst [vmem:[%s235_s4 + $0x2] sm:$0x1] %v102_v42 }
  0xb3   :  { %113 = vst [vmem:[%s235_s4 + $0x4] sm:$0x1] %v112_v43 }
  0xb4   :  { %122 = vst [vmem:[%s235_s4 + $0x6] sm:$0x1] %v121_v44 }

// kernel: proposednet_forward.27
= control target key start
LH: loop header
LB: loop body
LE: loop exit
PB: predicated region body
PF: predicated region fallthrough
CT: control target
= control target key end

     0   :  { %v86_v1 = vmov 0   ;;  %vm46_vm0 = vcmask 392192   ;;  %s125_s2 = inlined_call_operand.vmem [shape: bf16[48,128], index: 2, kind: input, shape index: {}]   ;;  %s126_s1 = inlined_call_operand.vmem [shape: f32[8,1], index: 1, kind: input, shape index: {}]   ;;  %s127_s0 = inlined_call_operand.vmem [shape: bf16[8,48], index: 0, kind: input, shape index: {}]   ;;  %s128_s3 = inlined_call_operand.vmem [shape: f32[8,128], index: 3, kind: output, shape index: {}]  }
   0x1   :  { %v83_v0 = vld [vmem:[%s125_s2 + $0x10] sm:$0xff]  ;;  %85 = vset.pattern.permute.xlu0 %v86_v1  ;;  %v22_v2 = vld [vmem:[%s126_s1] sm:$0xff]  ;;  %v82_v3 = vld [vmem:[%s125_s2 + $0x8] sm:$0xff] }
   0x2   :  { %55 = vmatpush.bf16.msra.mxu0 %v83_v0  ;;  %25 = vperm.xlu0 %85, %v22_v2   ;;  %v81_v4 = vld [vmem:[%s125_s2] sm:$0xff] }
   0x3   :  { %v15_v5 = vld [vmem:[%s127_s0] sm:$0xf] }
   0x6   :  { %56 = vmatpush.bf16.msra.mxu0 %v82_v3 }
   0xa   :  { %57 = vmatpush.bf16.msra.mxu0 %v81_v4 }
   0xd   :  { %80 = vmatmul.msk.bf16.vlgmr.msra.gmra.mxu0 %vm46_vm0, %v15_v5 }
  0x74   :  { %v26_v6 = vpop.permute.xlu0 %25 }
  0x8a   :  { %v59_v7 = vpop.f32.mrf.mxu0 }
  0x8b   :  { %v60_v8 = vadd.f32 %v59_v7, %v26_v6 }
  0x8d   :  { %63 = vst [vmem:[%s128_s3] sm:$0xff] %v60_v8 }
  0x92   :  { %v61_v9 = vpop.f32.mrf.mxu0 }

</bundles_post_ra>
